<compile_context>
chip_gen: v7x
topology: tpu7x:2x2x1
jax: 0.10.0
libtpu: 0.0.40
codegen_flags: <defaults>
</compile_context>

<pallas_src>
import numpy as np
import jax
import jax.numpy as jnp
from jax.experimental import pallas as pl
from jax.experimental.pallas import tpu as pltpu

# ------------------------- configuration -------------------------
OBS_IMG_SHAPE = (3, 30, 30)            # (C, H, W)
C_IN, H_IN, W_IN = OBS_IMG_SHAPE
OC0, OC1 = 8, 12                       # hyperparams['net']['out_channels']
OC1P = 16                              # OC1 zero-padded for 16-aligned flatten stores
K = 4                                  # kernel_size
S = 2                                  # stride
H1 = (H_IN - K) // S + 1               # 14
W1 = (W_IN - K) // S + 1               # 14
H2 = (H1 - K) // S + 1                 # 6
W2 = (W1 - K) // S + 1                 # 6
FLAT_FEATURES = OC1 * H2 * W2          # 432 (hard-coded in pi_cnn_net)
FLAT_PADDED = OC1P * H2 * W2           # 576 (kernel-internal, padded channels are zero)
LAYER_SIZE = 64
OUT_FEATURES = 4                       # action dimension
ACT_HIGH = 1.0                         # symmetric action bound (act_space.high[0])
BATCH = 2

KTAPS = K * K                          # 16 conv2 taps (i2, j2)
K1DIM = C_IN * K * K                   # 48  (conv1 im2col K)
K2DIM = OC0 * KTAPS                    # 128 (conv2 im2col K)

# Set to jnp.bfloat16 on v6e/v7x for the native MXU path (head / log-prob math
# stays f32 either way). f32 default keeps the tight correctness check below.
TRUNK_DTYPE = jnp.float32

VMEM_SPEC = pl.BlockSpec(memory_space=pltpu.MemorySpace.VMEM)


# ------------------------- fused Pallas kernel -------------------------
def make_fused_kernel(n, act_high):
    """Whole pi_cnn_net forward for a static batch size `n`."""
    log_2pi = float(np.log(2.0 * np.pi))
    log_2 = float(np.log(2.0))

    def kernel(p1_ref, wbd_ref, w2_ref, fc1w_ref, fc2w_ref, hw_ref, aux_ref,
               out_ref, flat_s):
        # ---- unpack the single aux operand (biases + eps) --------------------
        aux = aux_ref[...]                                  # (5+n, 128) f32
        bd_b = aux[0:1, :]                                  # (1, 128) conv1 bias, tiled per tap
        b2 = aux[1:2, 0:OC1P]                               # (1, 16)  conv2 bias (zero-padded)
        fc1b = aux[2:3, 0:LAYER_SIZE]                       # (1, 64)
        fc2b = aux[3:4, 0:LAYER_SIZE]                       # (1, 64)
        hb = aux[4:5, 0:2 * OUT_FEATURES]                   # (1, 8)   mu|log_sigma bias
        eps = aux[5:5 + n, 0:OUT_FEATURES]                  # (n, 4)

        # ---- conv1 (+ReLU) for all 16 conv2 taps: ONE block-diagonal GEMM ----
        # p1_ref: (72, 768) = 16 tap blocks of (72, 48) concatenated along lanes.
        # wbd_ref: (768, 128) block-diag(w1k x16). Result (72, 128) is exactly
        # the conv2 im2col patch matrix with K2 lane order (i2, j2, c1).
        p2 = jnp.maximum(
            jnp.dot(p1_ref[...], wbd_ref[...],
                    preferred_element_type=jnp.float32) + bd_b, 0.0)    # (72, 128)

        # ---- conv2 (+ReLU), channels zero-padded 12 -> 16 ---------------------
        y2 = jnp.maximum(
            jnp.dot(p2.astype(w2_ref.dtype), w2_ref[...],
                    preferred_element_type=jnp.float32) + b2, 0.0)      # (72, 16)

        # ---- flatten to (n, 576): 16-lane-wide, 16-aligned exact-shape stores -
        # rows of y2 are ordered (ho2, wo2, n); fc1 weight is pre-permuted /
        # zero-padded in the wrapper to match feature order (ho2, wo2, c2pad).
        for r in range(H2 * W2):
            flat_s[:, r * OC1P:(r + 1) * OC1P] = y2[r * n:(r + 1) * n, :]
        flat = flat_s[...]                                  # (n, 576)

        # ---- policy head (f32) ------------------------------------------------
        hh1 = jnp.maximum(
            jnp.dot(flat.astype(fc1w_ref.dtype), fc1w_ref[...],
                    preferred_element_type=jnp.float32) + fc1b, 0.0)
        hh2 = jnp.maximum(
            jnp.dot(hh1.astype(fc2w_ref.dtype), fc2w_ref[...],
                    preferred_element_type=jnp.float32) + fc2b, 0.0)
        # merged mu | log_sigma projection: one (64, 8) GEMM
        mls = jnp.dot(hh2, hw_ref[...], preferred_element_type=jnp.float32) + hb
        mu = mls[:, :OUT_FEATURES]
        log_sigma = mls[:, OUT_FEATURES:]

        # MultivariateNormal(mu, diag_embed(sigma)): Cholesky = diag(exp(0.5*ls)).
        std = jnp.exp(0.5 * log_sigma)                      # EUP (no sqrt)
        a = mu + std * eps                                  # rsample (eps==0 -> deterministic)

        # (a - mu)^2 / sigma == eps^2 analytically: no exp(-log_sigma), no divide.
        quad = jnp.sum(eps * eps, axis=-1, keepdims=True)
        logdet = jnp.sum(log_sigma, axis=-1, keepdims=True)
        logp = -0.5 * (OUT_FEATURES * log_2pi + logdet + quad)

        # tanh-squash correction: 2*(log 2 - a - softplus(-2a))
        softplus_m2a = jnp.logaddexp(0.0, -2.0 * a)
        corr = jnp.sum(2.0 * (log_2 - a - softplus_m2a), axis=-1, keepdims=True)

        # merged output: lanes 0..3 = action, lane 4 = log_prob
        out_ref[...] = jnp.concatenate(
            [act_high * jnp.tanh(a), logp - corr], axis=-1)

    return kernel


# ------------------------- wrapper / layout plumbing -------------------------
def _prep_conv1_patches(x):
    """x (N, C, 30, 30) NCHW -> (72, 768): 16 conv2-tap blocks of conv1 im2col
    rows concatenated along the LANE axis (block k = tap (i2, j2)). Within a
    block, rows are ordered (ho2, wo2, n) and lanes (c, i1, j1), matching
    conv1_w.reshape(OC0, -1)."""
    n = x.shape[0]
    sl = []
    for i1 in range(K):
        for j1 in range(K):
            sl.append(x[:, :, i1:i1 + S * H1:S, j1:j1 + S * W1:S])   # (N, C, 14, 14)
    p1 = jnp.stack(sl, axis=2)                                       # (N, C, 16, 14, 14)
    p1 = p1.transpose(0, 3, 4, 1, 2).reshape(n, H1, W1, K1DIM)       # K1 = c*16 + i1*4 + j1
    blocks = []
    for i2 in range(K):
        for j2 in range(K):
            blk = p1[:, i2:i2 + S * H2:S, j2:j2 + S * W2:S, :]       # (N, 6, 6, 48)
            blk = blk.transpose(1, 2, 0, 3).reshape(H2 * W2 * n, K1DIM)
            blocks.append(blk)
    return jnp.concatenate(blocks, axis=1)                            # (72, 768)


def _pad_lanes(v, width=128):
    return jnp.pad(v, ((0, 0), (0, width - v.shape[1])))


def pi_cnn_net_forward(x, params, eps, act_high=ACT_HIGH):
    """x: (N, C, H, W) float32, eps: (N, A). Returns (action (N, A), log_prob (N,))."""
    n = x.shape[0]
    p1dup = _prep_conv1_patches(x)                                      # (72, 768)

    # Weight packing (pure layout plumbing, done once per call outside the kernel).
    w1k = params["conv1_w"].reshape(OC0, K1DIM).T                       # (48, 8)
    w_bd = jnp.kron(jnp.eye(KTAPS, dtype=w1k.dtype), w1k)               # (768, 128) block-diag
    bd_b = jnp.tile(params["conv1_b"].reshape(1, OC0), (1, KTAPS))      # (1, 128)

    w2k = params["conv2_w"].transpose(2, 3, 1, 0).reshape(K2DIM, OC1)   # K2 order (i2, j2, c1)
    w2k = jnp.pad(w2k, ((0, 0), (0, OC1P - OC1)))                       # (128, 16)
    b2 = jnp.pad(params["conv2_b"].reshape(1, OC1), ((0, 0), (0, OC1P - OC1)))

    # fc1 rows permuted from PyTorch flatten order (c2, h2, w2) to kernel order
    # (h2, w2, c2) and zero-padded so the padded conv2 lanes contribute nothing.
    fc1_wp = params["fc1_w"].reshape(OC1, H2, W2, LAYER_SIZE).transpose(1, 2, 0, 3)
    fc1_wp = jnp.pad(fc1_wp, ((0, 0), (0, 0), (0, OC1P - OC1), (0, 0)))
    fc1_wp = fc1_wp.reshape(FLAT_PADDED, LAYER_SIZE)                    # (576, 64)

    head_w = jnp.concatenate([params["mu_w"], params["ls_w"]], axis=1)  # (64, 8)
    head_b = jnp.concatenate([params["mu_b"], params["ls_b"]], axis=1)  # (1, 8)

    # Pack all tiny operands into one (5+n, 128) f32 aux input.
    aux = jnp.concatenate([
        _pad_lanes(bd_b), _pad_lanes(b2), _pad_lanes(params["fc1_b"]),
        _pad_lanes(params["fc2_b"]), _pad_lanes(head_b), _pad_lanes(eps)], axis=0)

    trunk = lambda a: a.astype(TRUNK_DTYPE)

    kernel = make_fused_kernel(n, act_high)
    out = pl.pallas_call(
        kernel,
        out_shape=jax.ShapeDtypeStruct((n, OUT_FEATURES + 1), jnp.float32),
        in_specs=[VMEM_SPEC] * 7,
        out_specs=VMEM_SPEC,
        scratch_shapes=[
            pltpu.VMEM((n, FLAT_PADDED), jnp.float32),   # flattened conv2 output (N, 576)
        ],
    )(trunk(p1dup), trunk(w_bd), trunk(w2k), trunk(fc1_wp), trunk(params["fc2_w"]),
      head_w, aux)
    return out[:, :OUT_FEATURES], out[:, OUT_FEATURES]


# ------------------------- parameter init -------------------------
def init_params(key):
    def uniform(key, shape, fan_in):
        bound = 1.0 / np.sqrt(fan_in)
        return jax.random.uniform(key, shape, jnp.float32, -bound, bound)

    ks = jax.random.split(key, 12)
    p = {}
    p["conv1_w"] = uniform(ks[0], (OC0, C_IN, K, K), C_IN * K * K)
    p["conv1_b"] = uniform(ks[1], (OC0,), C_IN * K * K)
    p["conv2_w"] = uniform(ks[2], (OC1, OC0, K, K), OC0 * K * K)
    p["conv2_b"] = uniform(ks[3], (OC1,), OC0 * K * K)
    # Linear layers stored as (in, out) for x @ W + b (== PyTorch x @ W.T + b).
    p["fc1_w"] = uniform(ks[4], (FLAT_FEATURES, LAYER_SIZE), FLAT_FEATURES)
    p["fc1_b"] = uniform(ks[5], (1, LAYER_SIZE), FLAT_FEATURES)
    p["fc2_w"] = uniform(ks[6], (LAYER_SIZE, LAYER_SIZE), LAYER_SIZE)
    p["fc2_b"] = uniform(ks[7], (1, LAYER_SIZE), LAYER_SIZE)
    p["mu_w"] = uniform(ks[8], (LAYER_SIZE, OUT_FEATURES), LAYER_SIZE)
    p["mu_b"] = uniform(ks[9], (1, OUT_FEATURES), LAYER_SIZE)
    p["ls_w"] = uniform(ks[10], (LAYER_SIZE, OUT_FEATURES), LAYER_SIZE)
    p["ls_b"] = uniform(ks[11], (1, OUT_FEATURES), LAYER_SIZE)
    return p


# ------------------------- pure-JAX reference -------------------------
def reference_forward(x, params, eps, act_high=ACT_HIGH):
    def conv(x, w, b):
        y = jax.lax.conv_general_dilated(
            x, w, window_strides=(S, S), padding="VALID",
            dimension_numbers=("NCHW", "OIHW", "NCHW"))
        return jax.nn.relu(y + b[None, :, None, None])

    out = conv(x, params["conv1_w"], params["conv1_b"])
    out = conv(out, params["conv2_w"], params["conv2_b"])
    flat = out.reshape(-1, FLAT_FEATURES)          # PyTorch .view(-1, 6*6*12) on NCHW
    h1 = jax.nn.relu(flat @ params["fc1_w"] + params["fc1_b"])
    h2 = jax.nn.relu(h1 @ params["fc2_w"] + params["fc2_b"])
    mu = h2 @ params["mu_w"] + params["mu_b"]
    log_sigma = h2 @ params["ls_w"] + params["ls_b"]
    sigma = jnp.exp(log_sigma)
    a = mu + jnp.sqrt(sigma) * eps
    logp = -0.5 * (OUT_FEATURES * np.log(2 * np.pi)
                   + jnp.sum(log_sigma, -1)
                   + jnp.sum((a - mu) ** 2 / sigma, -1))
    logp = logp - jnp.sum(2.0 * (np.log(2.0) - a - jax.nn.softplus(-2.0 * a)), -1)
    return act_high * jnp.tanh(a), logp


# ------------------------- main -------------------------
if __name__ == "__main__":
    key = jax.random.PRNGKey(0)
    k_params, k_x, k_eps = jax.random.split(key, 3)

    params = init_params(k_params)
    x = jax.random.normal(k_x, (BATCH,) + OBS_IMG_SHAPE, jnp.float32)

    deterministic = False
    if deterministic:
        eps = jnp.zeros((BATCH, OUT_FEATURES), jnp.float32)
    else:
        eps = jax.random.normal(k_eps, (BATCH, OUT_FEATURES), jnp.float32)

    action, log_prob = jax.jit(pi_cnn_net_forward)(x, params, eps)
    jax.block_until_ready((action, log_prob))

    ref_action, ref_logp = reference_forward(x, params, eps)
    assert np.allclose(np.asarray(action), np.asarray(ref_action), atol=1e-4, rtol=1e-4)
    assert np.allclose(np.asarray(log_prob), np.asarray(ref_logp), atol=1e-3, rtol=1e-3)
    assert action.shape == (BATCH, OUT_FEATURES) and log_prob.shape == (BATCH,)

    print("KERNEL_OK")
</pallas_src>

<mosaic_0001>
module attributes {stable_mosaic.version = 11 : i64} {
  func.func @kernel(%arg0: memref<72x768xf32, #tpu.memory_space<vmem>>, %arg1: memref<768x128xf32, #tpu.memory_space<vmem>>, %arg2: memref<128x16xf32, #tpu.memory_space<vmem>>, %arg3: memref<576x64xf32, #tpu.memory_space<vmem>>, %arg4: memref<64x64xf32, #tpu.memory_space<vmem>>, %arg5: memref<64x8xf32, #tpu.memory_space<vmem>>, %arg6: memref<7x128xf32, #tpu.memory_space<vmem>>, %arg7: memref<2x5xf32, #tpu.memory_space<vmem>>, %arg8: memref<2x576xf32, #tpu.memory_space<vmem>>) attributes {dimension_semantics = [], scalar_prefetch = 0 : i64, scratch_operands = 1 : i64, tpu.core_type = #tpu.core_type<tc>} {
    %c0 = arith.constant 0 : index
    %c0_0 = arith.constant 0 : index
    %0 = vector.load %arg6[%c0, %c0_0] : memref<7x128xf32, #tpu.memory_space<vmem>>, vector<7x128xf32>
    %1 = vector.extract_strided_slice %0 {offsets = [0, 0], sizes = [1, 128], strides = [1, 1]} : vector<7x128xf32> to vector<1x128xf32>
    %2 = vector.extract_strided_slice %0 {offsets = [1, 0], sizes = [1, 16], strides = [1, 1]} : vector<7x128xf32> to vector<1x16xf32>
    %3 = vector.extract_strided_slice %0 {offsets = [2, 0], sizes = [1, 64], strides = [1, 1]} : vector<7x128xf32> to vector<1x64xf32>
    %4 = vector.extract_strided_slice %0 {offsets = [3, 0], sizes = [1, 64], strides = [1, 1]} : vector<7x128xf32> to vector<1x64xf32>
    %5 = vector.extract_strided_slice %0 {offsets = [4, 0], sizes = [1, 8], strides = [1, 1]} : vector<7x128xf32> to vector<1x8xf32>
    %6 = vector.extract_strided_slice %0 {offsets = [5, 0], sizes = [2, 4], strides = [1, 1]} : vector<7x128xf32> to vector<2x4xf32>
    %c0_1 = arith.constant 0 : index
    %c0_2 = arith.constant 0 : index
    %7 = vector.load %arg0[%c0_1, %c0_2] : memref<72x768xf32, #tpu.memory_space<vmem>>, vector<72x768xf32>
    %c0_3 = arith.constant 0 : index
    %c0_4 = arith.constant 0 : index
    %8 = vector.load %arg1[%c0_3, %c0_4] : memref<768x128xf32, #tpu.memory_space<vmem>>, vector<768x128xf32>
    %cst = arith.constant dense<0.000000e+00> : vector<72x128xf32>
    %9 = tpu.matmul %7, %8, %cst {dimension_numbers = #tpu.dot_dimension_numbers<[1], [0], [0], [1], [0, 0, 1, 1], [], []>} : vector<72x768xf32>, vector<768x128xf32>, vector<72x128xf32> -> vector<72x128xf32>
    %10 = vector.broadcast %1 : vector<1x128xf32> to vector<72x128xf32>
    %11 = arith.addf %9, %10 : vector<72x128xf32>
    %cst_5 = arith.constant 0.000000e+00 : f32
    %12 = vector.broadcast %cst_5 : f32 to vector<72x128xf32>
    %13 = arith.maximumf %11, %12 : vector<72x128xf32>
    %c0_6 = arith.constant 0 : index
    %c0_7 = arith.constant 0 : index
    %14 = vector.load %arg2[%c0_6, %c0_7] : memref<128x16xf32, #tpu.memory_space<vmem>>, vector<128x16xf32>
    %cst_8 = arith.constant dense<0.000000e+00> : vector<72x16xf32>
    %15 = tpu.matmul %13, %14, %cst_8 {dimension_numbers = #tpu.dot_dimension_numbers<[1], [0], [0], [1], [0, 0, 1, 1], [], []>} : vector<72x128xf32>, vector<128x16xf32>, vector<72x16xf32> -> vector<72x16xf32>
    %16 = vector.broadcast %2 : vector<1x16xf32> to vector<72x16xf32>
    %17 = arith.addf %15, %16 : vector<72x16xf32>
    %cst_9 = arith.constant 0.000000e+00 : f32
    %18 = vector.broadcast %cst_9 : f32 to vector<72x16xf32>
    %19 = arith.maximumf %17, %18 : vector<72x16xf32>
    %20 = vector.extract_strided_slice %19 {offsets = [0, 0], sizes = [2, 16], strides = [1, 1]} : vector<72x16xf32> to vector<2x16xf32>
    %c0_10 = arith.constant 0 : index
    %c0_11 = arith.constant 0 : index
    %21 = vector.load %arg8[%c0_10, %c0_11] : memref<2x576xf32, #tpu.memory_space<vmem>>, vector<2x16xf32>
    tpu.vector_store %arg8[%c0_10, %c0_11], %20 {strides = array<i32>} : memref<2x576xf32, #tpu.memory_space<vmem>>, vector<2x16xf32>,
    %22 = vector.extract_strided_slice %19 {offsets = [2, 0], sizes = [2, 16], strides = [1, 1]} : vector<72x16xf32> to vector<2x16xf32>
    %c0_12 = arith.constant 0 : index
    %c16 = arith.constant 16 : index
    %23 = vector.load %arg8[%c0_12, %c16] : memref<2x576xf32, #tpu.memory_space<vmem>>, vector<2x16xf32>
    tpu.vector_store %arg8[%c0_12, %c16], %22 {strides = array<i32>} : memref<2x576xf32, #tpu.memory_space<vmem>>, vector<2x16xf32>,
    %24 = vector.extract_strided_slice %19 {offsets = [4, 0], sizes = [2, 16], strides = [1, 1]} : vector<72x16xf32> to vector<2x16xf32>
    %c0_13 = arith.constant 0 : index
    %c32 = arith.constant 32 : index
    %25 = vector.load %arg8[%c0_13, %c32] : memref<2x576xf32, #tpu.memory_space<vmem>>, vector<2x16xf32>
    tpu.vector_store %arg8[%c0_13, %c32], %24 {strides = array<i32>} : memref<2x576xf32, #tpu.memory_space<vmem>>, vector<2x16xf32>,
    %26 = vector.extract_strided_slice %19 {offsets = [6, 0], sizes = [2, 16], strides = [1, 1]} : vector<72x16xf32> to vector<2x16xf32>
    %c0_14 = arith.constant 0 : index
    %c48 = arith.constant 48 : index
    %27 = vector.load %arg8[%c0_14, %c48] : memref<2x576xf32, #tpu.memory_space<vmem>>, vector<2x16xf32>
    tpu.vector_store %arg8[%c0_14, %c48], %26 {strides = array<i32>} : memref<2x576xf32, #tpu.memory_space<vmem>>, vector<2x16xf32>,
    %28 = vector.extract_strided_slice %19 {offsets = [8, 0], sizes = [2, 16], strides = [1, 1]} : vector<72x16xf32> to vector<2x16xf32>
    %c0_15 = arith.constant 0 : index
    %c64 = arith.constant 64 : index
    %29 = vector.load %arg8[%c0_15, %c64] : memref<2x576xf32, #tpu.memory_space<vmem>>, vector<2x16xf32>
    tpu.vector_store %arg8[%c0_15, %c64], %28 {strides = array<i32>} : memref<2x576xf32, #tpu.memory_space<vmem>>, vector<2x16xf32>,
    %30 = vector.extract_strided_slice %19 {offsets = [10, 0], sizes = [2, 16], strides = [1, 1]} : vector<72x16xf32> to vector<2x16xf32>
    %c0_16 = arith.constant 0 : index
    %c80 = arith.constant 80 : index
    %31 = vector.load %arg8[%c0_16, %c80] : memref<2x576xf32, #tpu.memory_space<vmem>>, vector<2x16xf32>
    tpu.vector_store %arg8[%c0_16, %c80], %30 {strides = array<i32>} : memref<2x576xf32, #tpu.memory_space<vmem>>, vector<2x16xf32>,
    %32 = vector.extract_strided_slice %19 {offsets = [12, 0], sizes = [2, 16], strides = [1, 1]} : vector<72x16xf32> to vector<2x16xf32>
    %c0_17 = arith.constant 0 : index
    %c96 = arith.constant 96 : index
    %33 = vector.load %arg8[%c0_17, %c96] : memref<2x576xf32, #tpu.memory_space<vmem>>, vector<2x16xf32>
    tpu.vector_store %arg8[%c0_17, %c96], %32 {strides = array<i32>} : memref<2x576xf32, #tpu.memory_space<vmem>>, vector<2x16xf32>,
    %34 = vector.extract_strided_slice %19 {offsets = [14, 0], sizes = [2, 16], strides = [1, 1]} : vector<72x16xf32> to vector<2x16xf32>
    %c0_18 = arith.constant 0 : index
    %c112 = arith.constant 112 : index
    %35 = vector.load %arg8[%c0_18, %c112] : memref<2x576xf32, #tpu.memory_space<vmem>>, vector<2x16xf32>
    tpu.vector_store %arg8[%c0_18, %c112], %34 {strides = array<i32>} : memref<2x576xf32, #tpu.memory_space<vmem>>, vector<2x16xf32>,
    %36 = vector.extract_strided_slice %19 {offsets = [16, 0], sizes = [2, 16], strides = [1, 1]} : vector<72x16xf32> to vector<2x16xf32>
    %c0_19 = arith.constant 0 : index
    %c128 = arith.constant 128 : index
    %37 = vector.load %arg8[%c0_19, %c128] : memref<2x576xf32, #tpu.memory_space<vmem>>, vector<2x16xf32>
    tpu.vector_store %arg8[%c0_19, %c128], %36 {strides = array<i32>} : memref<2x576xf32, #tpu.memory_space<vmem>>, vector<2x16xf32>,
    %38 = vector.extract_strided_slice %19 {offsets = [18, 0], sizes = [2, 16], strides = [1, 1]} : vector<72x16xf32> to vector<2x16xf32>
    %c0_20 = arith.constant 0 : index
    %c144 = arith.constant 144 : index
    %39 = vector.load %arg8[%c0_20, %c144] : memref<2x576xf32, #tpu.memory_space<vmem>>, vector<2x16xf32>
    tpu.vector_store %arg8[%c0_20, %c144], %38 {strides = array<i32>} : memref<2x576xf32, #tpu.memory_space<vmem>>, vector<2x16xf32>,
    %40 = vector.extract_strided_slice %19 {offsets = [20, 0], sizes = [2, 16], strides = [1, 1]} : vector<72x16xf32> to vector<2x16xf32>
    %c0_21 = arith.constant 0 : index
    %c160 = arith.constant 160 : index
    %41 = vector.load %arg8[%c0_21, %c160] : memref<2x576xf32, #tpu.memory_space<vmem>>, vector<2x16xf32>
    tpu.vector_store %arg8[%c0_21, %c160], %40 {strides = array<i32>} : memref<2x576xf32, #tpu.memory_space<vmem>>, vector<2x16xf32>,
    %42 = vector.extract_strided_slice %19 {offsets = [22, 0], sizes = [2, 16], strides = [1, 1]} : vector<72x16xf32> to vector<2x16xf32>
    %c0_22 = arith.constant 0 : index
    %c176 = arith.constant 176 : index
    %43 = vector.load %arg8[%c0_22, %c176] : memref<2x576xf32, #tpu.memory_space<vmem>>, vector<2x16xf32>
    tpu.vector_store %arg8[%c0_22, %c176], %42 {strides = array<i32>} : memref<2x576xf32, #tpu.memory_space<vmem>>, vector<2x16xf32>,
    %44 = vector.extract_strided_slice %19 {offsets = [24, 0], sizes = [2, 16], strides = [1, 1]} : vector<72x16xf32> to vector<2x16xf32>
    %c0_23 = arith.constant 0 : index
    %c192 = arith.constant 192 : index
    %45 = vector.load %arg8[%c0_23, %c192] : memref<2x576xf32, #tpu.memory_space<vmem>>, vector<2x16xf32>
    tpu.vector_store %arg8[%c0_23, %c192], %44 {strides = array<i32>} : memref<2x576xf32, #tpu.memory_space<vmem>>, vector<2x16xf32>,
    %46 = vector.extract_strided_slice %19 {offsets = [26, 0], sizes = [2, 16], strides = [1, 1]} : vector<72x16xf32> to vector<2x16xf32>
    %c0_24 = arith.constant 0 : index
    %c208 = arith.constant 208 : index
    %47 = vector.load %arg8[%c0_24, %c208] : memref<2x576xf32, #tpu.memory_space<vmem>>, vector<2x16xf32>
    tpu.vector_store %arg8[%c0_24, %c208], %46 {strides = array<i32>} : memref<2x576xf32, #tpu.memory_space<vmem>>, vector<2x16xf32>,
    %48 = vector.extract_strided_slice %19 {offsets = [28, 0], sizes = [2, 16], strides = [1, 1]} : vector<72x16xf32> to vector<2x16xf32>
    %c0_25 = arith.constant 0 : index
    %c224 = arith.constant 224 : index
    %49 = vector.load %arg8[%c0_25, %c224] : memref<2x576xf32, #tpu.memory_space<vmem>>, vector<2x16xf32>
    tpu.vector_store %arg8[%c0_25, %c224], %48 {strides = array<i32>} : memref<2x576xf32, #tpu.memory_space<vmem>>, vector<2x16xf32>,
    %50 = vector.extract_strided_slice %19 {offsets = [30, 0], sizes = [2, 16], strides = [1, 1]} : vector<72x16xf32> to vector<2x16xf32>
    %c0_26 = arith.constant 0 : index
    %c240 = arith.constant 240 : index
    %51 = vector.load %arg8[%c0_26, %c240] : memref<2x576xf32, #tpu.memory_space<vmem>>, vector<2x16xf32>
    tpu.vector_store %arg8[%c0_26, %c240], %50 {strides = array<i32>} : memref<2x576xf32, #tpu.memory_space<vmem>>, vector<2x16xf32>,
    %52 = vector.extract_strided_slice %19 {offsets = [32, 0], sizes = [2, 16], strides = [1, 1]} : vector<72x16xf32> to vector<2x16xf32>
    %c0_27 = arith.constant 0 : index
    %c256 = arith.constant 256 : index
    %53 = vector.load %arg8[%c0_27, %c256] : memref<2x576xf32, #tpu.memory_space<vmem>>, vector<2x16xf32>
    tpu.vector_store %arg8[%c0_27, %c256], %52 {strides = array<i32>} : memref<2x576xf32, #tpu.memory_space<vmem>>, vector<2x16xf32>,
    %54 = vector.extract_strided_slice %19 {offsets = [34, 0], sizes = [2, 16], strides = [1, 1]} : vector<72x16xf32> to vector<2x16xf32>
    %c0_28 = arith.constant 0 : index
    %c272 = arith.constant 272 : index
    %55 = vector.load %arg8[%c0_28, %c272] : memref<2x576xf32, #tpu.memory_space<vmem>>, vector<2x16xf32>
    tpu.vector_store %arg8[%c0_28, %c272], %54 {strides = array<i32>} : memref<2x576xf32, #tpu.memory_space<vmem>>, vector<2x16xf32>,
    %56 = vector.extract_strided_slice %19 {offsets = [36, 0], sizes = [2, 16], strides = [1, 1]} : vector<72x16xf32> to vector<2x16xf32>
    %c0_29 = arith.constant 0 : index
    %c288 = arith.constant 288 : index
    %57 = vector.load %arg8[%c0_29, %c288] : memref<2x576xf32, #tpu.memory_space<vmem>>, vector<2x16xf32>
    tpu.vector_store %arg8[%c0_29, %c288], %56 {strides = array<i32>} : memref<2x576xf32, #tpu.memory_space<vmem>>, vector<2x16xf32>,
    %58 = vector.extract_strided_slice %19 {offsets = [38, 0], sizes = [2, 16], strides = [1, 1]} : vector<72x16xf32> to vector<2x16xf32>
    %c0_30 = arith.constant 0 : index
    %c304 = arith.constant 304 : index
    %59 = vector.load %arg8[%c0_30, %c304] : memref<2x576xf32, #tpu.memory_space<vmem>>, vector<2x16xf32>
    tpu.vector_store %arg8[%c0_30, %c304], %58 {strides = array<i32>} : memref<2x576xf32, #tpu.memory_space<vmem>>, vector<2x16xf32>,
    %60 = vector.extract_strided_slice %19 {offsets = [40, 0], sizes = [2, 16], strides = [1, 1]} : vector<72x16xf32> to vector<2x16xf32>
    %c0_31 = arith.constant 0 : index
    %c320 = arith.constant 320 : index
    %61 = vector.load %arg8[%c0_31, %c320] : memref<2x576xf32, #tpu.memory_space<vmem>>, vector<2x16xf32>
    tpu.vector_store %arg8[%c0_31, %c320], %60 {strides = array<i32>} : memref<2x576xf32, #tpu.memory_space<vmem>>, vector<2x16xf32>,
    %62 = vector.extract_strided_slice %19 {offsets = [42, 0], sizes = [2, 16], strides = [1, 1]} : vector<72x16xf32> to vector<2x16xf32>
    %c0_32 = arith.constant 0 : index
    %c336 = arith.constant 336 : index
    %63 = vector.load %arg8[%c0_32, %c336] : memref<2x576xf32, #tpu.memory_space<vmem>>, vector<2x16xf32>
    tpu.vector_store %arg8[%c0_32, %c336], %62 {strides = array<i32>} : memref<2x576xf32, #tpu.memory_space<vmem>>, vector<2x16xf32>,
    %64 = vector.extract_strided_slice %19 {offsets = [44, 0], sizes = [2, 16], strides = [1, 1]} : vector<72x16xf32> to vector<2x16xf32>
    %c0_33 = arith.constant 0 : index
    %c352 = arith.constant 352 : index
    %65 = vector.load %arg8[%c0_33, %c352] : memref<2x576xf32, #tpu.memory_space<vmem>>, vector<2x16xf32>
    tpu.vector_store %arg8[%c0_33, %c352], %64 {strides = array<i32>} : memref<2x576xf32, #tpu.memory_space<vmem>>, vector<2x16xf32>,
    %66 = vector.extract_strided_slice %19 {offsets = [46, 0], sizes = [2, 16], strides = [1, 1]} : vector<72x16xf32> to vector<2x16xf32>
    %c0_34 = arith.constant 0 : index
    %c368 = arith.constant 368 : index
    %67 = vector.load %arg8[%c0_34, %c368] : memref<2x576xf32, #tpu.memory_space<vmem>>, vector<2x16xf32>
    tpu.vector_store %arg8[%c0_34, %c368], %66 {strides = array<i32>} : memref<2x576xf32, #tpu.memory_space<vmem>>, vector<2x16xf32>,
    %68 = vector.extract_strided_slice %19 {offsets = [48, 0], sizes = [2, 16], strides = [1, 1]} : vector<72x16xf32> to vector<2x16xf32>
    %c0_35 = arith.constant 0 : index
    %c384 = arith.constant 384 : index
    %69 = vector.load %arg8[%c0_35, %c384] : memref<2x576xf32, #tpu.memory_space<vmem>>, vector<2x16xf32>
    tpu.vector_store %arg8[%c0_35, %c384], %68 {strides = array<i32>} : memref<2x576xf32, #tpu.memory_space<vmem>>, vector<2x16xf32>,
    %70 = vector.extract_strided_slice %19 {offsets = [50, 0], sizes = [2, 16], strides = [1, 1]} : vector<72x16xf32> to vector<2x16xf32>
    %c0_36 = arith.constant 0 : index
    %c400 = arith.constant 400 : index
    %71 = vector.load %arg8[%c0_36, %c400] : memref<2x576xf32, #tpu.memory_space<vmem>>, vector<2x16xf32>
    tpu.vector_store %arg8[%c0_36, %c400], %70 {strides = array<i32>} : memref<2x576xf32, #tpu.memory_space<vmem>>, vector<2x16xf32>,
    %72 = vector.extract_strided_slice %19 {offsets = [52, 0], sizes = [2, 16], strides = [1, 1]} : vector<72x16xf32> to vector<2x16xf32>
    %c0_37 = arith.constant 0 : index
    %c416 = arith.constant 416 : index
    %73 = vector.load %arg8[%c0_37, %c416] : memref<2x576xf32, #tpu.memory_space<vmem>>, vector<2x16xf32>
    tpu.vector_store %arg8[%c0_37, %c416], %72 {strides = array<i32>} : memref<2x576xf32, #tpu.memory_space<vmem>>, vector<2x16xf32>,
    %74 = vector.extract_strided_slice %19 {offsets = [54, 0], sizes = [2, 16], strides = [1, 1]} : vector<72x16xf32> to vector<2x16xf32>
    %c0_38 = arith.constant 0 : index
    %c432 = arith.constant 432 : index
    %75 = vector.load %arg8[%c0_38, %c432] : memref<2x576xf32, #tpu.memory_space<vmem>>, vector<2x16xf32>
    tpu.vector_store %arg8[%c0_38, %c432], %74 {strides = array<i32>} : memref<2x576xf32, #tpu.memory_space<vmem>>, vector<2x16xf32>,
    %76 = vector.extract_strided_slice %19 {offsets = [56, 0], sizes = [2, 16], strides = [1, 1]} : vector<72x16xf32> to vector<2x16xf32>
    %c0_39 = arith.constant 0 : index
    %c448 = arith.constant 448 : index
    %77 = vector.load %arg8[%c0_39, %c448] : memref<2x576xf32, #tpu.memory_space<vmem>>, vector<2x16xf32>
    tpu.vector_store %arg8[%c0_39, %c448], %76 {strides = array<i32>} : memref<2x576xf32, #tpu.memory_space<vmem>>, vector<2x16xf32>,
    %78 = vector.extract_strided_slice %19 {offsets = [58, 0], sizes = [2, 16], strides = [1, 1]} : vector<72x16xf32> to vector<2x16xf32>
    %c0_40 = arith.constant 0 : index
    %c464 = arith.constant 464 : index
    %79 = vector.load %arg8[%c0_40, %c464] : memref<2x576xf32, #tpu.memory_space<vmem>>, vector<2x16xf32>
    tpu.vector_store %arg8[%c0_40, %c464], %78 {strides = array<i32>} : memref<2x576xf32, #tpu.memory_space<vmem>>, vector<2x16xf32>,
    %80 = vector.extract_strided_slice %19 {offsets = [60, 0], sizes = [2, 16], strides = [1, 1]} : vector<72x16xf32> to vector<2x16xf32>
    %c0_41 = arith.constant 0 : index
    %c480 = arith.constant 480 : index
    %81 = vector.load %arg8[%c0_41, %c480] : memref<2x576xf32, #tpu.memory_space<vmem>>, vector<2x16xf32>
    tpu.vector_store %arg8[%c0_41, %c480], %80 {strides = array<i32>} : memref<2x576xf32, #tpu.memory_space<vmem>>, vector<2x16xf32>,
    %82 = vector.extract_strided_slice %19 {offsets = [62, 0], sizes = [2, 16], strides = [1, 1]} : vector<72x16xf32> to vector<2x16xf32>
    %c0_42 = arith.constant 0 : index
    %c496 = arith.constant 496 : index
    %83 = vector.load %arg8[%c0_42, %c496] : memref<2x576xf32, #tpu.memory_space<vmem>>, vector<2x16xf32>
    tpu.vector_store %arg8[%c0_42, %c496], %82 {strides = array<i32>} : memref<2x576xf32, #tpu.memory_space<vmem>>, vector<2x16xf32>,
    %84 = vector.extract_strided_slice %19 {offsets = [64, 0], sizes = [2, 16], strides = [1, 1]} : vector<72x16xf32> to vector<2x16xf32>
    %c0_43 = arith.constant 0 : index
    %c512 = arith.constant 512 : index
    %85 = vector.load %arg8[%c0_43, %c512] : memref<2x576xf32, #tpu.memory_space<vmem>>, vector<2x16xf32>
    tpu.vector_store %arg8[%c0_43, %c512], %84 {strides = array<i32>} : memref<2x576xf32, #tpu.memory_space<vmem>>, vector<2x16xf32>,
    %86 = vector.extract_strided_slice %19 {offsets = [66, 0], sizes = [2, 16], strides = [1, 1]} : vector<72x16xf32> to vector<2x16xf32>
    %c0_44 = arith.constant 0 : index
    %c528 = arith.constant 528 : index
    %87 = vector.load %arg8[%c0_44, %c528] : memref<2x576xf32, #tpu.memory_space<vmem>>, vector<2x16xf32>
    tpu.vector_store %arg8[%c0_44, %c528], %86 {strides = array<i32>} : memref<2x576xf32, #tpu.memory_space<vmem>>, vector<2x16xf32>,
    %88 = vector.extract_strided_slice %19 {offsets = [68, 0], sizes = [2, 16], strides = [1, 1]} : vector<72x16xf32> to vector<2x16xf32>
    %c0_45 = arith.constant 0 : index
    %c544 = arith.constant 544 : index
    %89 = vector.load %arg8[%c0_45, %c544] : memref<2x576xf32, #tpu.memory_space<vmem>>, vector<2x16xf32>
    tpu.vector_store %arg8[%c0_45, %c544], %88 {strides = array<i32>} : memref<2x576xf32, #tpu.memory_space<vmem>>, vector<2x16xf32>,
    %90 = vector.extract_strided_slice %19 {offsets = [70, 0], sizes = [2, 16], strides = [1, 1]} : vector<72x16xf32> to vector<2x16xf32>
    %c0_46 = arith.constant 0 : index
    %c560 = arith.constant 560 : index
    %91 = vector.load %arg8[%c0_46, %c560] : memref<2x576xf32, #tpu.memory_space<vmem>>, vector<2x16xf32>
    tpu.vector_store %arg8[%c0_46, %c560], %90 {strides = array<i32>} : memref<2x576xf32, #tpu.memory_space<vmem>>, vector<2x16xf32>,
    %c0_47 = arith.constant 0 : index
    %c0_48 = arith.constant 0 : index
    %92 = vector.load %arg8[%c0_47, %c0_48] : memref<2x576xf32, #tpu.memory_space<vmem>>, vector<2x576xf32>
    %c0_49 = arith.constant 0 : index
    %c0_50 = arith.constant 0 : index
    %93 = vector.load %arg3[%c0_49, %c0_50] : memref<576x64xf32, #tpu.memory_space<vmem>>, vector<576x64xf32>
    %cst_51 = arith.constant dense<0.000000e+00> : vector<2x64xf32>
    %94 = tpu.matmul %92, %93, %cst_51 {dimension_numbers = #tpu.dot_dimension_numbers<[1], [0], [0], [1], [0, 0, 1, 1], [], []>} : vector<2x576xf32>, vector<576x64xf32>, vector<2x64xf32> -> vector<2x64xf32>
    %95 = vector.broadcast %3 : vector<1x64xf32> to vector<2x64xf32>
    %96 = arith.addf %94, %95 : vector<2x64xf32>
    %cst_52 = arith.constant 0.000000e+00 : f32
    %97 = vector.broadcast %cst_52 : f32 to vector<2x64xf32>
    %98 = arith.maximumf %96, %97 : vector<2x64xf32>
    %c0_53 = arith.constant 0 : index
    %c0_54 = arith.constant 0 : index
    %99 = vector.load %arg4[%c0_53, %c0_54] : memref<64x64xf32, #tpu.memory_space<vmem>>, vector<64x64xf32>
    %cst_55 = arith.constant dense<0.000000e+00> : vector<2x64xf32>
    %100 = tpu.matmul %98, %99, %cst_55 {dimension_numbers = #tpu.dot_dimension_numbers<[1], [0], [0], [1], [0, 0, 1, 1], [], []>} : vector<2x64xf32>, vector<64x64xf32>, vector<2x64xf32> -> vector<2x64xf32>
    %101 = vector.broadcast %4 : vector<1x64xf32> to vector<2x64xf32>
    %102 = arith.addf %100, %101 : vector<2x64xf32>
    %cst_56 = arith.constant 0.000000e+00 : f32
    %103 = vector.broadcast %cst_56 : f32 to vector<2x64xf32>
    %104 = arith.maximumf %102, %103 : vector<2x64xf32>
    %c0_57 = arith.constant 0 : index
    %c0_58 = arith.constant 0 : index
    %105 = vector.load %arg5[%c0_57, %c0_58] : memref<64x8xf32, #tpu.memory_space<vmem>>, vector<64x8xf32>
    %cst_59 = arith.constant dense<0.000000e+00> : vector<2x8xf32>
    %106 = tpu.matmul %104, %105, %cst_59 {dimension_numbers = #tpu.dot_dimension_numbers<[1], [0], [0], [1], [0, 0, 1, 1], [], []>} : vector<2x64xf32>, vector<64x8xf32>, vector<2x8xf32> -> vector<2x8xf32>
    %107 = vector.broadcast %5 : vector<1x8xf32> to vector<2x8xf32>
    %108 = arith.addf %106, %107 : vector<2x8xf32>
    %109 = vector.extract_strided_slice %108 {offsets = [0, 0], sizes = [2, 4], strides = [1, 1]} : vector<2x8xf32> to vector<2x4xf32>
    %110 = vector.extract_strided_slice %108 {offsets = [0, 4], sizes = [2, 4], strides = [1, 1]} : vector<2x8xf32> to vector<2x4xf32>
    %cst_60 = arith.constant 5.000000e-01 : f32
    %111 = vector.broadcast %cst_60 : f32 to vector<2x4xf32>
    %112 = arith.mulf %111, %110 : vector<2x4xf32>
    %113 = math.exp %112 : vector<2x4xf32>
    %114 = arith.mulf %113, %6 : vector<2x4xf32>
    %115 = arith.addf %109, %114 : vector<2x4xf32>
    %116 = arith.mulf %6, %6 : vector<2x4xf32>
    %cst_61 = arith.constant dense<0.000000e+00> : vector<2xf32>
    %117 = vector.multi_reduction <add>, %116, %cst_61 [1] : vector<2x4xf32> to vector<2xf32>
    %118 = vector.shape_cast %117 : vector<2xf32> to vector<2x1xf32>
    %cst_62 = arith.constant dense<0.000000e+00> : vector<2xf32>
    %119 = vector.multi_reduction <add>, %110, %cst_62 [1] : vector<2x4xf32> to vector<2xf32>
    %120 = vector.shape_cast %119 : vector<2xf32> to vector<2x1xf32>
    %cst_63 = arith.constant 7.35150814 : f32
    %121 = vector.broadcast %cst_63 : f32 to vector<2x1xf32>
    %122 = arith.addf %121, %120 : vector<2x1xf32>
    %123 = arith.addf %122, %118 : vector<2x1xf32>
    %cst_64 = arith.constant -5.000000e-01 : f32
    %124 = vector.broadcast %cst_64 : f32 to vector<2x1xf32>
    %125 = arith.mulf %124, %123 : vector<2x1xf32>
    %cst_65 = arith.constant -2.000000e+00 : f32
    %126 = vector.broadcast %cst_65 : f32 to vector<2x4xf32>
    %127 = arith.mulf %126, %115 : vector<2x4xf32>
    %cst_66 = arith.constant 0.000000e+00 : f32
    %128 = vector.broadcast %cst_66 : f32 to vector<2x4xf32>
    %129 = arith.maximumf %128, %127 : vector<2x4xf32>
    %130 = vector.broadcast %cst_66 : f32 to vector<2x4xf32>
    %131 = arith.subf %130, %127 : vector<2x4xf32>
    %132 = arith.cmpf one, %131, %131 : vector<2x4xf32>
    %133 = vector.broadcast %cst_66 : f32 to vector<2x4xf32>
    %134 = arith.addf %133, %127 : vector<2x4xf32>
    %135 = math.absf %131 : vector<2x4xf32>
    %cst_67 = arith.constant 0.000000e+00 : f32
    %136 = vector.broadcast %cst_67 : f32 to vector<2x4xf32>
    %137 = arith.subf %136, %135 : vector<2x4xf32>
    %138 = math.exp %137 : vector<2x4xf32>
    %139 = math.log1p %138 : vector<2x4xf32>
    %140 = arith.addf %129, %139 : vector<2x4xf32>
    %141 = arith.select %132, %134, %140 : vector<2x4xi1>, vector<2x4xf32>
    %cst_68 = arith.constant 0.693147182 : f32
    %142 = vector.broadcast %cst_68 : f32 to vector<2x4xf32>
    %143 = arith.subf %142, %115 : vector<2x4xf32>
    %144 = arith.subf %143, %141 : vector<2x4xf32>
    %cst_69 = arith.constant 2.000000e+00 : f32
    %145 = vector.broadcast %cst_69 : f32 to vector<2x4xf32>
    %146 = arith.mulf %145, %144 : vector<2x4xf32>
    %cst_70 = arith.constant dense<0.000000e+00> : vector<2xf32>
    %147 = vector.multi_reduction <add>, %146, %cst_70 [1] : vector<2x4xf32> to vector<2xf32>
    %148 = vector.shape_cast %147 : vector<2xf32> to vector<2x1xf32>
    %149 = math.tanh %115 : vector<2x4xf32>
    %cst_71 = arith.constant 1.000000e+00 : f32
    %150 = vector.broadcast %cst_71 : f32 to vector<2x4xf32>
    %151 = arith.mulf %150, %149 : vector<2x4xf32>
    %152 = arith.subf %125, %148 : vector<2x1xf32>
    %153 = tpu.concatenate %151, %152 in 1 : vector<2x4xf32>, vector<2x1xf32> -> vector<2x5xf32>
    %c0_72 = arith.constant 0 : index
    %c0_73 = arith.constant 0 : index
    %154 = vector.load %arg7[%c0_72, %c0_73] : memref<2x5xf32, #tpu.memory_space<vmem>>, vector<2x5xf32>
    tpu.vector_store %arg7[%c0_72, %c0_73], %153 {strides = array<i32>} : memref<2x5xf32, #tpu.memory_space<vmem>>, vector<2x5xf32>,
    return
  }
}

</mosaic_0001>

<bundles_post_ra>
// kernel: pi_cnn_net_forward.1
= control target key start
LH: loop header
LB: loop body
LE: loop exit
PB: predicated region body
PF: predicated region fallthrough
CT: control target
= control target key end

     0   :  { %vm2187_vm0 = vmmov 0   ;;  %vm659_vm1 = vcmask 123904   ;;  %s2191_s30 = smov 32   ;;  %s2192_s8 = smov 48   ;;  %vm673_vm2 = vcmask 255104   ;;  %vm686_vm3 = vcmask 386304   ;;  %s3202_s1 = inlined_call_operand.vmem [shape: f32[768,128], index: 1, kind: input, shape index: {}]   ;;  %s3203_s0 = inlined_call_operand.vmem [shape: f32[72,768], index: 0, kind: input, shape index: {}]   ;;  %s3204_s2 = inlined_call_operand.vmem [shape: f32[128,16], index: 2, kind: input, shape index: {}]   ;;  %s3205_s6 = inlined_call_operand.vmem [shape: f32[7,128], index: 6, kind: input, shape index: {}]   ;;  %s3206_s3 = inlined_call_operand.vmem [shape: f32[576,64], index: 3, kind: input, shape index: {}]   ;;  %s3207_s4 = inlined_call_operand.vmem [shape: f32[64,64], index: 4, kind: input, shape index: {}]   ;;  %s3208_s5 = inlined_call_operand.vmem [shape: f32[64,8], index: 5, kind: input, shape index: {}]   ;;  %s3209_s7 = inlined_call_operand.vmem [shape: f32[2,5], index: 7, kind: output, shape index: {}]  }
   0x1   :  { %v97_v0 = vld [vmem:[%s3202_s1 + $0x80] sm:$0xff]  ;;  %v98_v1 = vld [vmem:[%s3202_s1 + $0x88] sm:$0xff]  ;;  %v99_v11 = vld [vmem:[%s3202_s1 + $0x90] sm:$0xff]  ;;  %s2193_s9 = smov 64   ;;  %s2194_s10 = smov 80   ;;  %vm692_vm4 = vcmask 517504  }
   0x2   :  { %v81_v2 = vld [vmem:[%s3202_s1] sm:$0xff]  ;;  %v1943_v3 = vpack.c.bf16 %v98_v1, %v97_v0  ;;  %v82_v4 = vld [vmem:[%s3202_s1 + $0x8] sm:$0xff]  ;;  %v100_v13 = vld [vmem:[%s3202_s1 + $0x98] sm:$0xff]  ;;  %s2195_s11 = smov 96   ;;  %s2196_s12 = smov 112   ;;  %vm705_vm5 = vcmask 648704  }
   0x3   :  { %v129_v5 = vld [vmem:[%s3202_s1 + $0x180] sm:$0xff]  ;;  %v130_v6 = vld [vmem:[%s3202_s1 + $0x188] sm:$0xff]  ;;  %v1945_v7 = vpack.c.bf16 %v82_v4, %v81_v2  ;;  %v83_v14 = vld [vmem:[%s3202_s1 + $0x10] sm:$0xff]  ;;  %v1947_v16 = vpack.c.bf16 %v100_v13, %v99_v11  ;;  %vm711_vm6 = vcmask 779904   ;;  %vm724_vm7 = vcmask 911104   ;;  %s2197_s18 = smov 4  }
   0x4   :  { %v1975_v8 = vpack.c.bf16 %v130_v6, %v129_v5  ;;  %v113_v9 = vld [vmem:[%s3202_s1 + $0x100] sm:$0xff]  ;;  %v114_v10 = vld [vmem:[%s3202_s1 + $0x108] sm:$0xff]  ;;  %1944 = vmatprep.subr.bf16.mxu0 %v1943_v3  ;;  %v84_v15 = vld [vmem:[%s3202_s1 + $0x18] sm:$0xff]  ;;  %vm730_vm8 = vcmask 1042304   ;;  %vm1066_vm9 = vcmask 523264   ;;  %vm1466_vm10 = vcmask 30725  }
   0x5   :  { %v1977_v12 = vpack.c.bf16 %v114_v10, %v113_v9  ;;  %1946 = vmatpush3.bf16.msra.mxu0 %v1945_v7  ;;  %v1949_v17 = vpack.c.bf16 %v84_v15, %v83_v14  ;;  %v131_v18 = vld [vmem:[%s3202_s1 + $0x190] sm:$0xff]  ;;  %v132_v19 = vld [vmem:[%s3202_s1 + $0x198] sm:$0xff]  ;;  %v101_v23 = vld [vmem:[%s3202_s1 + $0xa0] sm:$0xff]  ;;  %vm1474_vm11 = vcmask 25600   ;;  %vm1516_vm14 = vcmask 31744  }
   0x6   :  { %1976 = vmatprep.subr.bf16.mxu1 %v1975_v8  ;;  %v115_v20 = vld [vmem:[%s3202_s1 + $0x110] sm:$0xff]  ;;  %v1979_v21 = vpack.c.bf16 %v132_v19, %v131_v18  ;;  %v116_v22 = vld [vmem:[%s3202_s1 + $0x118] sm:$0xff]  ;;  %v102_v24 = vld [vmem:[%s3202_s1 + $0xa8] sm:$0xff]  ;;  %1948 = vmatprep.subr.bf16.mxu0 %v1947_v16  ;;  %vm1518_vm15 = vcmask 33792  }
   0x7   :  { %1978 = vmatpush3.bf16.msra.mxu1 %v1977_v12  ;;  %v1981_v25 = vpack.c.bf16 %v116_v22, %v115_v20  ;;  %v1951_v26 = vpack.c.bf16 %v102_v24, %v101_v23  ;;  %v85_v27 = vld [vmem:[%s3202_s1 + $0x20] sm:$0xff]  ;;  %v86_v28 = vld [vmem:[%s3202_s1 + $0x28] sm:$0xff]  ;;  %v103_v35 = vld [vmem:[%s3202_s1 + $0xb0] sm:$0xff] }
   0x8   :  { %v133_v29 = vld [vmem:[%s3202_s1 + $0x1a0] sm:$0xff]  ;;  %1980 = vmatprep.subr.bf16.mxu1 %v1979_v21  ;;  %v134_v30 = vld [vmem:[%s3202_s1 + $0x1a8] sm:$0xff]  ;;  %v1953_v33 = vpack.c.bf16 %v86_v28, %v85_v27  ;;  %v104_v36 = vld [vmem:[%s3202_s1 + $0xb8] sm:$0xff] }
   0x9   :  { %v117_v31 = vld [vmem:[%s3202_s1 + $0x120] sm:$0xff]  ;;  %v118_v32 = vld [vmem:[%s3202_s1 + $0x128] sm:$0xff]  ;;  %1950 = vmatpush3.bf16.msra.mxu0 %v1949_v17  ;;  %v1983_v34 = vpack.c.bf16 %v134_v30, %v133_v29  ;;  %v87_v37 = vld [vmem:[%s3202_s1 + $0x30] sm:$0xff]  ;;  %v1955_v39 = vpack.c.bf16 %v104_v36, %v103_v35 }
   0xa   :  { %1952 = vmatprep.subr.bf16.mxu0 %v1951_v26  ;;  %v1985_v38 = vpack.c.bf16 %v118_v32, %v117_v31  ;;  %v88_v40 = vld [vmem:[%s3202_s1 + $0x38] sm:$0xff]  ;;  %v135_v41 = vld [vmem:[%s3202_s1 + $0x1b0] sm:$0xff]  ;;  %v105_v46 = vld [vmem:[%s3202_s1 + $0xc0] sm:$0xff] }
   0xb   :  { %1982 = vmatpush3.bf16.msra.mxu1 %v1981_v25  ;;  %v136_v42 = vld [vmem:[%s3202_s1 + $0x1b8] sm:$0xff]  ;;  %v119_v44 = vld [vmem:[%s3202_s1 + $0x130] sm:$0xff]  ;;  %v106_v47 = vld [vmem:[%s3202_s1 + $0xc8] sm:$0xff]  ;;  %v1957_v48 = vpack.c.bf16 %v88_v40, %v87_v37 }
   0xc   :  { %1984 = vmatprep.subr.bf16.mxu1 %v1983_v34  ;;  %v1987_v43 = vpack.c.bf16 %v136_v42, %v135_v41  ;;  %v120_v45 = vld [vmem:[%s3202_s1 + $0x138] sm:$0xff]  ;;  %v137_v49 = vld [vmem:[%s3202_s1 + $0x1c0] sm:$0xff]  ;;  %v138_v50 = vld [vmem:[%s3202_s1 + $0x1c8] sm:$0xff]  ;;  %v1959_v52 = vpack.c.bf16 %v106_v47, %v105_v46 }
   0xd   :  { %1954 = vmatpush3.bf16.msra.mxu0 %v1953_v33  ;;  %v1989_v51 = vpack.c.bf16 %v120_v45, %v119_v44  ;;  %v89_v53 = vld [vmem:[%s3202_s1 + $0x40] sm:$0xff]  ;;  %v90_v54 = vld [vmem:[%s3202_s1 + $0x48] sm:$0xff]  ;;  %v1991_v56 = vpack.c.bf16 %v138_v50, %v137_v49  ;;  %v107_v58 = vld [vmem:[%s3202_s1 + $0xd0] sm:$0xff] }
   0xe   :  { %1956 = vmatprep.subr.bf16.mxu0 %v1955_v39  ;;  %v121_v55 = vld [vmem:[%s3202_s1 + $0x140] sm:$0xff]  ;;  %v122_v57 = vld [vmem:[%s3202_s1 + $0x148] sm:$0xff]  ;;  %v108_v59 = vld [vmem:[%s3202_s1 + $0xd8] sm:$0xff]  ;;  %v1961_v62 = vpack.c.bf16 %v90_v54, %v89_v53 }
   0xf   :  { %1986 = vmatpush3.bf16.msra.mxu1 %v1985_v38  ;;  %v139_v60 = vld [vmem:[%s3202_s1 + $0x1d0] sm:$0xff]  ;;  %v140_v61 = vld [vmem:[%s3202_s1 + $0x1d8] sm:$0xff]  ;;  %v1993_v63 = vpack.c.bf16 %v122_v57, %v121_v55  ;;  %v1963_v0 = vpack.c.bf16 %v108_v59, %v107_v58  ;;  %v109_v6 = vld [vmem:[%s3202_s1 + $0xe0] sm:$0xff] }
  0x10   :  { %1988 = vmatprep.subr.bf16.mxu1 %v1987_v43  ;;  %v91_v1 = vld [vmem:[%s3202_s1 + $0x50] sm:$0xff]  ;;  %v92_v2 = vld [vmem:[%s3202_s1 + $0x58] sm:$0xff]  ;;  %v1995_v4 = vpack.c.bf16 %v140_v61, %v139_v60  ;;  %v110_v7 = vld [vmem:[%s3202_s1 + $0xe8] sm:$0xff] }
  0x11   :  { %1958 = vmatpush3.bf16.msra.mxu0 %v1957_v48  ;;  %v123_v3 = vld [vmem:[%s3202_s1 + $0x150] sm:$0xff]  ;;  %v124_v5 = vld [vmem:[%s3202_s1 + $0x158] sm:$0xff]  ;;  %v141_v8 = vld [vmem:[%s3202_s1 + $0x1e0] sm:$0xff]  ;;  %v1965_v10 = vpack.c.bf16 %v92_v2, %v91_v1  ;;  %v1967_v14 = vpack.c.bf16 %v110_v7, %v109_v6 }
  0x12   :  { %1960 = vmatprep.subr.bf16.mxu0 %v1959_v52  ;;  %v142_v9 = vld [vmem:[%s3202_s1 + $0x1e8] sm:$0xff]  ;;  %v93_v11 = vld [vmem:[%s3202_s1 + $0x60] sm:$0xff]  ;;  %v1997_v13 = vpack.c.bf16 %v124_v5, %v123_v3  ;;  %v111_v19 = vld [vmem:[%s3202_s1 + $0xf0] sm:$0xff] }
  0x13   :  { %1990 = vmatpush3.bf16.msra.mxu1 %v1989_v51  ;;  %v28_v12 = vld [vmem:[%s3203_s0 + $0x8] sm:$0xff]  ;;  %v125_v16 = vld [vmem:[%s3202_s1 + $0x160] sm:$0xff]  ;;  %v1999_v18 = vpack.c.bf16 %v142_v9, %v141_v8  ;;  %v112_v20 = vld [vmem:[%s3202_s1 + $0xf8] sm:$0xff] }
  0x14   :  { %1992 = vmatprep.subr.bf16.mxu1 %v1991_v56  ;;  %v94_v15 = vld [vmem:[%s3202_s1 + $0x68] sm:$0xff]  ;;  %245 = vmatprep.mubr.f32.mxu0 %v28_v12  ;;  %v30_v21 = vld [vmem:[%s3203_s0 + $0x18] sm:$0xff]  ;;  %v143_v22 = vld [vmem:[%s3202_s1 + $0x1f0] sm:$0xff]  ;;  %v1971_v26 = vpack.c.bf16 %v112_v20, %v111_v19 }
  0x15   :  { %1962 = vmatpush3.bf16.msra.mxu0 %v1961_v62  ;;  %v126_v17 = vld [vmem:[%s3202_s1 + $0x168] sm:$0xff]  ;;  %v144_v23 = vld [vmem:[%s3202_s1 + $0x1f8] sm:$0xff]  ;;  %355 = vmatprep.mubr.f32.mxu1 %v30_v21  ;;  %v1969_v24 = vpack.c.bf16 %v94_v15, %v93_v11  ;;  %v95_v27 = vld [vmem:[%s3202_s1 + $0x70] sm:$0xff] }
  0x16   :  { %1964 = vmatprep.subr.bf16.mxu0 %v1963_v0  ;;  %v2001_v25 = vpack.c.bf16 %v126_v17, %v125_v16  ;;  %v96_v28 = vld [vmem:[%s3202_s1 + $0x78] sm:$0xff]  ;;  %v127_v29 = vld [vmem:[%s3202_s1 + $0x170] sm:$0xff]  ;;  %v2003_v30 = vpack.c.bf16 %v144_v23, %v143_v22  ;;  %v161_v32 = vld [vmem:[%s3202_s1 + $0x280] sm:$0xff] }
  0x17   :  { %1994 = vmatpush3.bf16.msra.mxu1 %v1993_v63  ;;  %v128_v31 = vld [vmem:[%s3202_s1 + $0x178] sm:$0xff]  ;;  %v162_v33 = vld [vmem:[%s3202_s1 + $0x288] sm:$0xff]  ;;  %v1973_v34 = vpack.c.bf16 %v96_v28, %v95_v27  ;;  %v145_v37 = vld [vmem:[%s3202_s1 + $0x200] sm:$0xff] }
  0x18   :  { %1996 = vmatprep.subr.bf16.mxu1 %v1995_v4  ;;  %v2005_v35 = vpack.c.bf16 %v128_v31, %v127_v29  ;;  %v2007_v36 = vpack.c.bf16 %v162_v33, %v161_v32  ;;  %v146_v38 = vld [vmem:[%s3202_s1 + $0x208] sm:$0xff]  ;;  %v163_v39 = vld [vmem:[%s3202_s1 + $0x290] sm:$0xff]  ;;  %v164_v40 = vld [vmem:[%s3202_s1 + $0x298] sm:$0xff] }
  0x19   :  { %1966 = vmatpush3.bf16.msra.mxu0 %v1965_v10  ;;  %v27_v41 = vld [vmem:[%s3203_s0] sm:$0xff]  ;;  %v2009_v42 = vpack.c.bf16 %v146_v38, %v145_v37  ;;  %v29_v43 = vld [vmem:[%s3203_s0 + $0x10] sm:$0xff]  ;;  %v148_v45 = vld [vmem:[%s3202_s1 + $0x218] sm:$0xff]  ;;  %v2011_v48 = vpack.c.bf16 %v164_v40, %v163_v39 }
  0x1a   :  { %1968 = vmatprep.subr.bf16.mxu0 %v1967_v14  ;;  %v147_v44 = vld [vmem:[%s3202_s1 + $0x210] sm:$0xff]  ;;  %v34_v46 = vld [vmem:[%s3203_s0 + $0x38] sm:$0xff]  ;;  %v36_v47 = vld [vmem:[%s3203_s0 + $0x48] sm:$0xff] }
  0x1b   :  { %1998 = vmatpush3.bf16.msra.mxu1 %v1997_v13  ;;  %v165_v49 = vld [vmem:[%s3202_s1 + $0x2a0] sm:$0xff]  ;;  %v166_v50 = vld [vmem:[%s3202_s1 + $0x2a8] sm:$0xff]  ;;  %v33_v51 = vld [vmem:[%s3203_s0 + $0x30] sm:$0xff]  ;;  %v2013_v52 = vpack.c.bf16 %v148_v45, %v147_v44 }
  0x1c   :  { %2000 = vmatprep.subr.bf16.mxu1 %v1999_v18  ;;  %v35_v53 = vld [vmem:[%s3203_s0 + $0x40] sm:$0xff]  ;;  %v150_v55 = vld [vmem:[%s3202_s1 + $0x228] sm:$0xff]  ;;  %v42_v57 = vld [vmem:[%s3203_s0 + $0x78] sm:$0xff]  ;;  %v2015_v58 = vpack.c.bf16 %v166_v50, %v165_v49 }
  0x1d   :  { %1970 = vmatpush3.bf16.msra.mxu0 %v1969_v24  ;;  %v149_v54 = vld [vmem:[%s3202_s1 + $0x220] sm:$0xff]  ;;  %v40_v56 = vld [vmem:[%s3203_s0 + $0x68] sm:$0xff]  ;;  %v167_v59 = vld [vmem:[%s3202_s1 + $0x2b0] sm:$0xff] }
  0x1e   :  { %1972 = vmatprep.subr.bf16.mxu0 %v1971_v26  ;;  %v168_v60 = vld [vmem:[%s3202_s1 + $0x2b8] sm:$0xff]  ;;  %v39_v61 = vld [vmem:[%s3203_s0 + $0x60] sm:$0xff]  ;;  %v2017_v62 = vpack.c.bf16 %v150_v55, %v149_v54  ;;  %v41_v63 = vld [vmem:[%s3203_s0 + $0x70] sm:$0xff] }
  0x1f   :  { %2002 = vmatpush3.bf16.msra.mxu1 %v2001_v25  ;;  %v46_v0 = vld [vmem:[%s3203_s0 + $0x98] sm:$0xff]  ;;  %v48_v1 = vld [vmem:[%s3203_s0 + $0xa8] sm:$0xff]  ;;  %v2019_v2 = vpack.c.bf16 %v168_v60, %v167_v59  ;;  %v151_v3 = vld [vmem:[%s3202_s1 + $0x230] sm:$0xff] }
  0x20   :  { %2004 = vmatprep.subr.bf16.mxu1 %v2003_v30  ;;  %v152_v4 = vld [vmem:[%s3202_s1 + $0x238] sm:$0xff]  ;;  %v169_v5 = vld [vmem:[%s3202_s1 + $0x2c0] sm:$0xff]  ;;  %v170_v6 = vld [vmem:[%s3202_s1 + $0x2c8] sm:$0xff] }
  0x21   :  { %1974 = vmatpush3.bf16.msra.mxu0 %v1973_v34  ;;  %v45_v7 = vld [vmem:[%s3203_s0 + $0x90] sm:$0xff]  ;;  %v47_v8 = vld [vmem:[%s3203_s0 + $0xa0] sm:$0xff]  ;;  %v52_v9 = vld [vmem:[%s3203_s0 + $0xc8] sm:$0xff]  ;;  %v2021_v10 = vpack.c.bf16 %v152_v4, %v151_v3  ;;  %v2023_v12 = vpack.c.bf16 %v170_v6, %v169_v5 }
  0x22   :  { %2008 = vmatprep.subr.bf16.mxu0 %v2007_v36  ;;  %v54_v11 = vld [vmem:[%s3203_s0 + $0xd8] sm:$0xff]  ;;  %v153_v13 = vld [vmem:[%s3202_s1 + $0x240] sm:$0xff]  ;;  %v154_v14 = vld [vmem:[%s3202_s1 + $0x248] sm:$0xff] }
  0x23   :  { %2006 = vmatpush3.bf16.msra.mxu1 %v2005_v35  ;;  %v171_v15 = vld [vmem:[%s3202_s1 + $0x2d0] sm:$0xff]  ;;  %v172_v16 = vld [vmem:[%s3202_s1 + $0x2d8] sm:$0xff]  ;;  %v51_v17 = vld [vmem:[%s3203_s0 + $0xc0] sm:$0xff]  ;;  %v2025_v20 = vpack.c.bf16 %v154_v14, %v153_v13 }
  0x24   :  { %246 = vmatmul.mubr.f32.vlgmr.msra.gmra.mrb[0].mxu0 %v27_v41  ;;  %v53_v18 = vld [vmem:[%s3203_s0 + $0xd0] sm:$0xff]  ;;  %v58_v19 = vld [vmem:[%s3203_s0 + $0xf8] sm:$0xff]  ;;  %v60_v21 = vld [vmem:[%s3203_s0 + $0x108] sm:$0xff]  ;;  %v2027_v22 = vpack.c.bf16 %v172_v16, %v171_v15 }
  0x25   :  { %2010 = vmatpush3.bf16.msra.mxu0 %v2009_v42  ;;  %250 = vmatprep.mubr.f32.mxu0 %v34_v46  ;;  %v155_v23 = vld [vmem:[%s3202_s1 + $0x250] sm:$0xff]  ;;  %v156_v24 = vld [vmem:[%s3202_s1 + $0x258] sm:$0xff]  ;;  %v173_v25 = vld [vmem:[%s3202_s1 + $0x2e0] sm:$0xff] }
  0x26   :  { %356 = vmatmul.mubr.f32.vlgmr.msra.gmra.mrb[0].mxu1 %v29_v43  ;;  %2012 = vmatprep.subr.bf16.mxu0 %v2011_v48  ;;  %v174_v26 = vld [vmem:[%s3202_s1 + $0x2e8] sm:$0xff]  ;;  %v57_v27 = vld [vmem:[%s3203_s0 + $0xf0] sm:$0xff]  ;;  %v59_v28 = vld [vmem:[%s3203_s0 + $0x100] sm:$0xff]  ;;  %v2029_v30 = vpack.c.bf16 %v156_v24, %v155_v23 }
  0x27   :  { %360 = vmatprep.mubr.f32.mxu1 %v36_v47  ;;  %v64_v29 = vld [vmem:[%s3203_s0 + $0x128] sm:$0xff]  ;;  %v66_v31 = vld [vmem:[%s3203_s0 + $0x138] sm:$0xff]  ;;  %v2031_v32 = vpack.c.bf16 %v174_v26, %v173_v25  ;;  %v157_v33 = vld [vmem:[%s3202_s1 + $0x260] sm:$0xff] }
  0x28   :  { %251 = vmatmul.mubr.f32.gmra.mrb[2].mxu0 %v33_v51  ;;  %v158_v34 = vld [vmem:[%s3202_s1 + $0x268] sm:$0xff]  ;;  %v175_v35 = vld [vmem:[%s3202_s1 + $0x2f0] sm:$0xff]  ;;  %v176_v36 = vld [vmem:[%s3202_s1 + $0x2f8] sm:$0xff] }
  0x29   :  { %2014 = vmatpush3.bf16.msra.mxu0 %v2013_v52  ;;  %255 = vmatprep.mubr.f32.mxu0 %v40_v56  ;;  %v63_v37 = vld [vmem:[%s3203_s0 + $0x120] sm:$0xff]  ;;  %v65_v38 = vld [vmem:[%s3203_s0 + $0x130] sm:$0xff]  ;;  %v70_v39 = vld [vmem:[%s3203_s0 + $0x158] sm:$0xff]  ;;  %v2033_v40 = vpack.c.bf16 %v158_v34, %v157_v33  ;;  %v2035_v42 = vpack.c.bf16 %v176_v36, %v175_v35 }
  0x2a   :  { %361 = vmatmul.mubr.f32.gmra.mrb[2].mxu1 %v35_v53  ;;  %2016 = vmatprep.subr.bf16.mxu0 %v2015_v58  ;;  %v72_v41 = vld [vmem:[%s3203_s0 + $0x168] sm:$0xff]  ;;  %v159_v43 = vld [vmem:[%s3202_s1 + $0x270] sm:$0xff]  ;;  %v160_v44 = vld [vmem:[%s3202_s1 + $0x278] sm:$0xff] }
  0x2b   :  { %365 = vmatprep.mubr.f32.mxu1 %v42_v57  ;;  %v69_v45 = vld [vmem:[%s3203_s0 + $0x150] sm:$0xff]  ;;  %v71_v46 = vld [vmem:[%s3203_s0 + $0x160] sm:$0xff]  ;;  %v76_v47 = vld [vmem:[%s3203_s0 + $0x188] sm:$0xff]  ;;  %v2037_v48 = vpack.c.bf16 %v160_v44, %v159_v43 }
  0x2c   :  { %256 = vmatmul.mubr.f32.gmra.mrb[4].mxu0 %v39_v61  ;;  %v78_v49 = vld [vmem:[%s3203_s0 + $0x198] sm:$0xff]  ;;  %v75_v50 = vld [vmem:[%s3203_s0 + $0x180] sm:$0xff]  ;;  %v77_v51 = vld [vmem:[%s3203_s0 + $0x190] sm:$0xff] }
  0x2d   :  { %2018 = vmatpush3.bf16.msra.mxu0 %v2017_v62  ;;  %260 = vmatprep.mubr.f32.mxu0 %v46_v0  ;;  %v32_v52 = vld [vmem:[%s3203_s0 + $0x28] sm:$0xff]  ;;  %v31_v53 = vld [vmem:[%s3203_s0 + $0x20] sm:$0xff]  ;;  %v38_v54 = vld [vmem:[%s3203_s0 + $0x58] sm:$0xff] }
  0x2e   :  { %366 = vmatmul.mubr.f32.gmra.mrb[4].mxu1 %v41_v63  ;;  %2020 = vmatprep.subr.bf16.mxu0 %v2019_v2  ;;  %v37_v55 = vld [vmem:[%s3203_s0 + $0x50] sm:$0xff]  ;;  %v44_v56 = vld [vmem:[%s3203_s0 + $0x88] sm:$0xff]  ;;  %v43_v57 = vld [vmem:[%s3203_s0 + $0x80] sm:$0xff] }
  0x2f   :  { %370 = vmatprep.mubr.f32.mxu1 %v48_v1  ;;  %v50_v58 = vld [vmem:[%s3203_s0 + $0xb8] sm:$0xff]  ;;  %v49_v59 = vld [vmem:[%s3203_s0 + $0xb0] sm:$0xff]  ;;  %v56_v60 = vld [vmem:[%s3203_s0 + $0xe8] sm:$0xff] }
  0x30   :  { %261 = vmatmul.mubr.f32.gmra.mrb[6].mxu0 %v45_v7  ;;  %v55_v61 = vld [vmem:[%s3203_s0 + $0xe0] sm:$0xff]  ;;  %v62_v62 = vld [vmem:[%s3203_s0 + $0x118] sm:$0xff]  ;;  %v61_v63 = vld [vmem:[%s3203_s0 + $0x110] sm:$0xff] }
  0x31   :  { %265 = vmatprep.mubr.f32.mxu0 %v52_v9  ;;  %2022 = vmatpush3.bf16.msra.mxu0 %v2021_v10  ;;  %v68_v0 = vld [vmem:[%s3203_s0 + $0x148] sm:$0xff]  ;;  %v67_v1 = vld [vmem:[%s3203_s0 + $0x140] sm:$0xff]  ;;  %v74_v2 = vld [vmem:[%s3203_s0 + $0x178] sm:$0xff] }
  0x32   :  { %371 = vmatmul.mubr.f32.gmra.mrb[6].mxu1 %v47_v8  ;;  %2024 = vmatprep.subr.bf16.mxu0 %v2023_v12  ;;  %v73_v3 = vld [vmem:[%s3203_s0 + $0x170] sm:$0xff]  ;;  %v80_v4 = vld [vmem:[%s3203_s0 + $0x1a8] sm:$0xff]  ;;  %v79_v5 = vld [vmem:[%s3203_s0 + $0x1a0] sm:$0xff]  ;;  %v2186_v8 = vmov 0.0|0.0  }
  0x33   :  { %375 = vmatprep.mubr.f32.mxu1 %v54_v11  ;;  %v520_v6 = vld [vmem:[%s3204_s2] sm:$0xff]  ;;  %v521_v7 = vld [vmem:[%s3204_s2 + $0x8] sm:$0xff]  ;;  %2039 = vmatprep.subr.bf16.mxu1 %v2186_v8  ;;  %v522_v10 = vld [vmem:[%s3204_s2 + $0x10] sm:$0xff] }
  0x34   :  { %266 = vmatmul.mubr.f32.gmra.mrb[8].mxu0 %v51_v17  ;;  %v2040_v9 = vpack.c.bf16 %v521_v7, %v520_v6  ;;  %v523_v11 = vld [vmem:[%s3204_s2 + $0x18] sm:$0xff]  ;;  %v524_v13 = vld [vmem:[%s3204_s2 + $0x20] sm:$0xff]  ;;  %v525_v14 = vld [vmem:[%s3204_s2 + $0x28] sm:$0xff] }
  0x35   :  { %270 = vmatprep.mubr.f32.mxu0 %v58_v19  ;;  %2026 = vmatpush3.bf16.msra.mxu0 %v2025_v20  ;;  %v2043_v12 = vpack.c.bf16 %v523_v11, %v522_v10  ;;  %v2046_v15 = vpack.c.bf16 %v525_v14, %v524_v13  ;;  %v526_v16 = vld [vmem:[%s3204_s2 + $0x30] sm:$0xff]  ;;  %v527_v17 = vld [vmem:[%s3204_s2 + $0x38] sm:$0xff]  ;;  %v528_v19 = vld [vmem:[%s3204_s2 + $0x40] sm:$0xff] }
  0x36   :  { %376 = vmatmul.mubr.f32.gmra.mrb[8].mxu1 %v53_v18  ;;  %2028 = vmatprep.subr.bf16.mxu0 %v2027_v22  ;;  %v2049_v18 = vpack.c.bf16 %v527_v17, %v526_v16  ;;  %v529_v20 = vld [vmem:[%s3204_s2 + $0x48] sm:$0xff]  ;;  %v530_v22 = vld [vmem:[%s3204_s2 + $0x50] sm:$0xff]  ;;  %v531_v23 = vld [vmem:[%s3204_s2 + $0x58] sm:$0xff] }
  0x37   :  { %380 = vmatprep.mubr.f32.mxu1 %v60_v21  ;;  %2041 = vmatpush3.bf16.msra.mxu1 %v2040_v9  ;;  %v2052_v21 = vpack.c.bf16 %v529_v20, %v528_v19  ;;  %v2055_v24 = vpack.c.bf16 %v531_v23, %v530_v22  ;;  %v532_v25 = vld [vmem:[%s3204_s2 + $0x60] sm:$0xff]  ;;  %v533_v26 = vld [vmem:[%s3204_s2 + $0x68] sm:$0xff] }
  0x38   :  { %271 = vmatmul.mubr.f32.gmra.mrb[10].mxu0 %v57_v27  ;;  %2042 = vmatprep.subr.bf16.mxu1 %v2186_v8  ;;  %v2058_v27 = vpack.c.bf16 %v533_v26, %v532_v25  ;;  %v2753_v35 = vld [vmem:[%s3205_s6] sm:$0x7f] }
  0x39   :  { %275 = vmatprep.mubr.f32.mxu0 %v64_v29  ;;  %2030 = vmatpush3.bf16.msra.mxu0 %v2029_v30  ;;  %v535_v29 = vld [vmem:[%s3204_s2 + $0x78] sm:$0xff] }
  0x3a   :  { %381 = vmatmul.mubr.f32.gmra.mrb[10].mxu1 %v59_v28  ;;  %2032 = vmatprep.subr.bf16.mxu0 %v2031_v32  ;;  %v534_v28 = vld [vmem:[%s3204_s2 + $0x70] sm:$0xff]  ;;  %v177_v32 = vlaneseq  ;;  %s2190_s2 = smov 16  }
  0x3b   :  { %385 = vmatprep.mubr.f32.mxu1 %v66_v31  ;;  %2044 = vmatpush3.bf16.msra.mxu1 %v2043_v12  ;;  %v2061_v30 = vpack.c.bf16 %v535_v29, %v534_v28  ;;  %v2188_v31 = vmov 0.0  }
  0x3c   :  { %276 = vmatmul.mubr.f32.gmra.mrb[12].mxu0 %v63_v37  ;;  %2045 = vmatprep.subr.bf16.mxu1 %v2186_v8  ;;  %v2747_v33 = vshrl.u32 %v177_v32, 7 }
  0x3d   :  { %280 = vmatprep.mubr.f32.mxu0 %v70_v39  ;;  %2034 = vmatpush3.bf16.msra.mxu0 %v2033_v40 }
  0x3e   :  { %386 = vmatmul.mubr.f32.gmra.mrb[12].mxu1 %v65_v38  ;;  %2036 = vmatprep.subr.bf16.mxu0 %v2035_v42  ;;  %v179_v34 = vsub.s32 0, %v2747_v33 }
  0x3f   :  { %390 = vmatprep.mubr.f32.mxu1 %v72_v41  ;;  %2047 = vmatpush3.bf16.msra.mxu1 %v2046_v15 }
  0x40   :  { %281 = vmatmul.mubr.f32.gmra.mrb[14].mxu0 %v69_v45  ;;  %2048 = vmatprep.subr.bf16.mxu1 %v2186_v8  ;;  %v2756_v37 = vrot.slane %v2753_v35, %v179_v34 }
  0x41   :  { %285 = vmatprep.mubr.f32.mxu0 %v76_v47  ;;  %2038 = vmatpush3.bf16.msra.mxu0 %v2037_v48 }
  0x42   :  { %391 = vmatmul.mubr.f32.gmra.mrb[14].mxu1 %v71_v46 }
  0x43   :  { %395 = vmatprep.mubr.f32.mxu1 %v78_v49  ;;  %2050 = vmatpush3.bf16.msra.mxu1 %v2049_v18 }
  0x44   :  { %286 = vmatmul.mubr.f32.gmra.mrb[16].mxu0 %v75_v50  ;;  %2051 = vmatprep.subr.bf16.mxu1 %v2186_v8 }
  0x45   :  { %465 = vmatprep.mubr.f32.mxu0 %v32_v52 }
  0x46   :  { %396 = vmatmul.mubr.f32.gmra.mrb[16].mxu1 %v77_v51 }
  0x47   :  { %2053 = vmatpush3.bf16.msra.mxu1 %v2052_v21  ;;  %1859 = vmatprep.mubr.msk.f32.mxu1 %vm2187_vm0, %v2188_v31 }
  0x48   :  { %466 = vmatmul.mubr.f32.vlgmr.msra.gmra.mrb[18].mxu0 %v31_v53  ;;  %2054 = vmatprep.subr.bf16.mxu1 %v2186_v8 }
  0x49   :  { %470 = vmatprep.mubr.f32.mxu0 %v38_v54 }
  0x4b   :  { %2056 = vmatpush3.bf16.msra.mxu1 %v2055_v24 }
  0x4c   :  { %471 = vmatmul.mubr.f32.gmra.mrb[20].mxu0 %v37_v55  ;;  %2057 = vmatprep.subr.bf16.mxu1 %v2186_v8 }
  0x4d   :  { %475 = vmatprep.mubr.f32.mxu0 %v44_v56 }
  0x4f   :  { %2059 = vmatpush3.bf16.msra.mxu1 %v2058_v27 }
  0x50   :  { %476 = vmatmul.mubr.f32.gmra.mrb[22].mxu0 %v43_v57  ;;  %2060 = vmatprep.subr.bf16.mxu1 %v2186_v8 }
  0x51   :  { %480 = vmatprep.mubr.f32.mxu0 %v50_v58 }
  0x53   :  { %2062 = vmatpush3.bf16.msra.mxu1 %v2061_v30 }
  0x54   :  { %481 = vmatmul.mubr.f32.gmra.mrb[24].mxu0 %v49_v59 }
  0x55   :  { %485 = vmatprep.mubr.f32.mxu0 %v56_v60 }
  0x58   :  { %486 = vmatmul.mubr.f32.gmra.mrb[26].mxu0 %v55_v61 }
  0x59   :  { %490 = vmatprep.mubr.f32.mxu0 %v62_v62 }
  0x5c   :  { %491 = vmatmul.mubr.f32.gmra.mrb[28].mxu0 %v61_v63 }
  0x5d   :  { %495 = vmatprep.mubr.f32.mxu0 %v68_v0 }
  0x60   :  { %496 = vmatmul.mubr.f32.gmra.mrb[30].mxu0 %v67_v1 }
  0x61   :  { %500 = vmatprep.mubr.f32.mxu0 %v74_v2 }
  0x64   :  { %501 = vmatmul.mubr.f32.gmra.mrb[32].mxu0 %v73_v3 }
  0x65   :  { %505 = vmatprep.mubr.f32.mxu0 %v80_v4 }
  0x68   :  { %506 = vmatmul.mubr.f32.gmra.mrb[34].mxu0 %v79_v5 }
  0xf7   :  { %v1560_v36 = vpop.f32.mrb[0].mxu0 }
  0xf8   :  { %v1561_v38 = vpop.f32.mrb[1].mxu0 }
  0xf9   :  { %v1619_v39 = vpop.f32.mrb[0].mxu1  ;;  %v1562_v40 = vadd.f32 %v1561_v38, %v1560_v36 }
  0xfa   :  { %v1620_v41 = vpop.f32.mrb[1].mxu1 }
  0xfb   :  { %v1621_v42 = vadd.f32 %v1620_v41, %v1619_v39  ;;  %v248_v43 = vadd.f32 %v1562_v40, %v2756_v37  ;;  %v1563_v44 = vpop.f32.mrb[2].mxu0 }
  0xfc   :  { %v1564_v45 = vpop.f32.mrb[3].mxu0 }
  0xfd   :  { %v1622_v46 = vpop.f32.mrb[2].mxu1  ;;  %v2759_v47 = vadd.f32 %v1621_v42, %v248_v43  ;;  %v1565_v48 = vadd.f32 %v1564_v45, %v1563_v44 }
  0xfe   :  { %v1623_v49 = vpop.f32.mrb[3].mxu1 }
  0xff   :  { %v1624_v50 = vadd.f32 %v1623_v49, %v1622_v46  ;;  %v253_v51 = vadd.f32 %v1565_v48, %v2756_v37  ;;  %v1566_v52 = vpop.f32.mrb[4].mxu0 }
 0x100   :  { %v1567_v53 = vpop.f32.mrb[5].mxu0 }
 0x101   :  { %v1625_v54 = vpop.f32.mrb[4].mxu1  ;;  %v363_v55 = vadd.f32 %v1624_v50, %v253_v51  ;;  %v1568_v56 = vadd.f32 %v1567_v53, %v1566_v52 }
 0x102   :  { %v1626_v57 = vpop.f32.mrb[5].mxu1 }
 0x103   :  { %v1627_v58 = vadd.f32 %v1626_v57, %v1625_v54  ;;  %v258_v59 = vadd.f32 %v1568_v56, %v2756_v37  ;;  %v1569_v60 = vpop.f32.mrb[6].mxu0 }
 0x104   :  { %v1570_v61 = vpop.f32.mrb[7].mxu0 }
 0x105   :  { %v1628_v62 = vpop.f32.mrb[6].mxu1  ;;  %v368_v63 = vadd.f32 %v1627_v58, %v258_v59  ;;  %v1571_v0 = vadd.f32 %v1570_v61, %v1569_v60 }
 0x106   :  { %v1629_v1 = vpop.f32.mrb[7].mxu1 }
 0x107   :  { %v1630_v2 = vadd.f32 %v1629_v1, %v1628_v62  ;;  %v263_v3 = vadd.f32 %v1571_v0, %v2756_v37  ;;  %v1572_v4 = vpop.f32.mrb[8].mxu0 }
 0x108   :  { %v1573_v5 = vpop.f32.mrb[9].mxu0 }
 0x109   :  { %v1631_v6 = vpop.f32.mrb[8].mxu1  ;;  %v373_v7 = vadd.f32 %v1630_v2, %v263_v3  ;;  %v1574_v9 = vadd.f32 %v1573_v5, %v1572_v4 }
 0x10a   :  { %v1632_v10 = vpop.f32.mrb[9].mxu1 }
 0x10b   :  { %v1633_v11 = vadd.f32 %v1632_v10, %v1631_v6  ;;  %v268_v12 = vadd.f32 %v1574_v9, %v2756_v37  ;;  %v1575_v13 = vpop.f32.mrb[10].mxu0 }
 0x10c   :  { %v1576_v14 = vpop.f32.mrb[11].mxu0 }
 0x10d   :  { %v1634_v15 = vpop.f32.mrb[10].mxu1  ;;  %v378_v16 = vadd.f32 %v1633_v11, %v268_v12  ;;  %v1577_v17 = vadd.f32 %v1576_v14, %v1575_v13 }
 0x10e   :  { %v1635_v18 = vpop.f32.mrb[11].mxu1 }
 0x10f   :  { %v1636_v19 = vadd.f32 %v1635_v18, %v1634_v15  ;;  %v273_v20 = vadd.f32 %v1577_v17, %v2756_v37  ;;  %v1578_v21 = vpop.f32.mrb[12].mxu0 }
 0x110   :  { %v1579_v22 = vpop.f32.mrb[13].mxu0 }
 0x111   :  { %v1637_v23 = vpop.f32.mrb[12].mxu1  ;;  %v383_v24 = vadd.f32 %v1636_v19, %v273_v20  ;;  %v1580_v25 = vadd.f32 %v1579_v22, %v1578_v21 }
 0x112   :  { %v1638_v26 = vpop.f32.mrb[13].mxu1 }
 0x113   :  { %v1639_v27 = vadd.f32 %v1638_v26, %v1637_v23  ;;  %v278_v28 = vadd.f32 %v1580_v25, %v2756_v37  ;;  %v1581_v29 = vpop.f32.mrb[14].mxu0 }
 0x114   :  { %v1582_v30 = vpop.f32.mrb[15].mxu0 }
 0x115   :  { %v1640_v32 = vpop.f32.mrb[14].mxu1  ;;  %v388_v34 = vadd.f32 %v1639_v27, %v278_v28  ;;  %v1583_v36 = vadd.f32 %v1582_v30, %v1581_v29 }
 0x116   :  { %v1641_v38 = vpop.f32.mrb[15].mxu1 }
 0x117   :  { %v1642_v39 = vadd.f32 %v1641_v38, %v1640_v32  ;;  %v283_v40 = vadd.f32 %v1583_v36, %v2756_v37  ;;  %v1584_v41 = vpop.f32.mrb[16].mxu0  ;;  %v2189_v32 = vmov 1983009808   ;;  %v538_v36 = vsub.s32 1, %v2747_v33 }
 0x118   :  { %v1585_v42 = vpop.f32.mrb[17].mxu0 }
 0x119   :  { %v1643_v43 = vpop.f32.mrb[16].mxu1  ;;  %v393_v44 = vadd.f32 %v1642_v39, %v283_v40  ;;  %v1586_v45 = vadd.f32 %v1585_v42, %v1584_v41  ;;  %v2788_v39 = vrot.slane %v2753_v35, %v538_v36 }
 0x11a   :  { %v1644_v46 = vpop.f32.mrb[17].mxu1 }
 0x11b   :  { %v1645_v48 = vadd.f32 %v1644_v46, %v1643_v43  ;;  %v288_v49 = vadd.f32 %v1586_v45, %v2756_v37  ;;  %v1678_v50 = vpop.f32.mrb[18].mxu0 }
 0x11c   :  { %v1679_v51 = vpop.f32.mrb[19].mxu0 }
 0x11d   :  { %v398_v52 = vadd.f32 %v1645_v48, %v288_v49  ;;  %v1680_v53 = vadd.f32 %v1679_v51, %v1678_v50 }
 0x11f   :  { %v468_v54 = vadd.f32 %v1680_v53, %v2759_v47  ;;  %v1681_v56 = vpop.f32.mrb[20].mxu0 }
 0x120   :  { %v1682_v57 = vpop.f32.mrb[21].mxu0 }
 0x121   :  { %v511_v58 = vmax.f32 %v468_v54, 0.0  ;;  %v1683_v59 = vadd.f32 %v1682_v57, %v1681_v56 }
 0x123   :  { %v473_v60 = vadd.f32 %v1683_v59, %v363_v55  ;;  %v1684_v61 = vpop.f32.mrb[22].mxu0  ;;  %1860 = vmatmul.mubr.f32.vlgmr.msra.gmra.mrb[18].mxu1 %v511_v58 }
 0x124   :  { %v1685_v62 = vpop.f32.mrb[23].mxu0  ;;  %1862 = vmatprep.mubr.msk.f32.mxu1 %vm2187_vm0, %v2188_v31 }
 0x125   :  { %v512_v0 = vmax.f32 %v473_v60, 0.0  ;;  %v1686_v1 = vadd.f32 %v1685_v62, %v1684_v61 }
 0x127   :  { %v478_v37 = vadd.f32 %v1686_v1, %v368_v63  ;;  %v1687_v2 = vpop.f32.mrb[24].mxu0  ;;  %1863 = vmatmul.mubr.f32.gmra.mrb[20].mxu1 %v512_v0 }
 0x128   :  { %v1688_v3 = vpop.f32.mrb[25].mxu0  ;;  %1865 = vmatprep.mubr.msk.f32.mxu1 %vm2187_vm0, %v2188_v31 }
 0x129   :  { %v513_v47 = vmax.f32 %v478_v37, 0.0  ;;  %v1689_v4 = vadd.f32 %v1688_v3, %v1687_v2 }
 0x12b   :  { %v483_v5 = vadd.f32 %v1689_v4, %v373_v7  ;;  %v1690_v6 = vpop.f32.mrb[26].mxu0  ;;  %1866 = vmatmul.mubr.f32.gmra.mrb[22].mxu1 %v513_v47 }
 0x12c   :  { %v1691_v55 = vpop.f32.mrb[27].mxu0  ;;  %1868 = vmatprep.mubr.msk.f32.mxu1 %vm2187_vm0, %v2188_v31 }
 0x12d   :  { %v514_v9 = vmax.f32 %v483_v5, 0.0  ;;  %v1692_v10 = vadd.f32 %v1691_v55, %v1690_v6 }
 0x12f   :  { %v488_v11 = vadd.f32 %v1692_v10, %v378_v16  ;;  %v1693_v12 = vpop.f32.mrb[28].mxu0  ;;  %1869 = vmatmul.mubr.f32.gmra.mrb[24].mxu1 %v514_v9 }
 0x130   :  { %v1694_v63 = vpop.f32.mrb[29].mxu0  ;;  %1871 = vmatprep.mubr.msk.f32.mxu1 %vm2187_vm0, %v2188_v31 }
 0x131   :  { %v515_v13 = vmax.f32 %v488_v11, 0.0  ;;  %v1695_v14 = vadd.f32 %v1694_v63, %v1693_v12 }
 0x133   :  { %v493_v15 = vadd.f32 %v1695_v14, %v383_v24  ;;  %v1696_v17 = vpop.f32.mrb[30].mxu0  ;;  %1872 = vmatmul.mubr.f32.gmra.mrb[26].mxu1 %v515_v13 }
 0x134   :  { %v1697_v7 = vpop.f32.mrb[31].mxu0  ;;  %1874 = vmatprep.mubr.msk.f32.mxu1 %vm2187_vm0, %v2188_v31 }
 0x135   :  { %v516_v18 = vmax.f32 %v493_v15, 0.0  ;;  %v1698_v19 = vadd.f32 %v1697_v7, %v1696_v17 }
 0x137   :  { %v498_v20 = vadd.f32 %v1698_v19, %v388_v34  ;;  %v1699_v21 = vpop.f32.mrb[32].mxu0  ;;  %1875 = vmatmul.mubr.f32.gmra.mrb[28].mxu1 %v516_v18  ;;  %v663_v34 = vunpack.c.l.s4 %v2189_v32  ;;  %v961_v32 = vld [vmem:[%s3206_s3 + $0x8] sm:$0xff] }
 0x138   :  { %v1700_v16 = vpop.f32.mrb[33].mxu0  ;;  %1877 = vmatprep.mubr.msk.f32.mxu1 %vm2187_vm0, %v2188_v31 }
 0x139   :  { %v517_v22 = vmax.f32 %v498_v20, 0.0  ;;  %v1701_v23 = vadd.f32 %v1700_v16, %v1699_v21  ;;  %v664_v38 = vunpack.c.0.s8 %v663_v34 }
 0x13b   :  { %v503_v25 = vadd.f32 %v1701_v23, %v393_v44  ;;  %v1702_v26 = vpop.f32.mrb[34].mxu0  ;;  %1878 = vmatmul.mubr.f32.gmra.mrb[30].mxu1 %v517_v22  ;;  %v2791_v41 = vsub.s32 %v664_v38, %v2747_v33 }
 0x13c   :  { %v1703_v24 = vpop.f32.mrb[35].mxu0  ;;  %1880 = vmatprep.mubr.msk.f32.mxu1 %vm2187_vm0, %v2188_v31 }
 0x13d   :  { %v518_v27 = vmax.f32 %v503_v25, 0.0  ;;  %v1704_v28 = vadd.f32 %v1703_v24, %v1702_v26  ;;  %v976_v26 = vld [vmem:[%s3206_s3 + $0x80] sm:$0xff]  ;;  %v977_v24 = vld [vmem:[%s3206_s3 + $0x88] sm:$0xff] }
 0x13f   :  { %v508_v29 = vadd.f32 %v1704_v28, %v398_v52  ;;  %1881 = vmatmul.mubr.f32.gmra.mrb[32].mxu1 %v518_v27 }
 0x140   :  { %1883 = vmatprep.mubr.msk.f32.mxu1 %vm2187_vm0, %v2188_v31 }
 0x141   :  { %v519_v30 = vmax.f32 %v508_v29, 0.0  ;;  %v2063_v29 = vpack.c.bf16 %v977_v24, %v976_v26  ;;  %v1014_v26 = vld [vmem:[%s3206_s3 + $0x1b0] sm:$0xff] }
 0x143   :  { %1884 = vmatmul.mubr.f32.gmra.mrb[34].mxu1 %v519_v30  ;;  %v960_v30 = vld [vmem:[%s3206_s3] sm:$0xff]  ;;  %2064 = vmatprep.subr.bf16.mxu0 %v2063_v29 }
 0x1f6   :  { %v606_v40 = vpop.f32.mrb[18].mxu1 }
 0x1f7   :  { %v607_v42 = vadd.f32 %v606_v40, %v2788_v39  ;;  %v1861_v43 = vpop.f32.mrb[19].mxu1  ;;  %v2065_v40 = vpack.c.bf16 %v961_v32, %v960_v30  ;;  %v998_v32 = vld [vmem:[%s3206_s3 + $0x130] sm:$0xff] }
 0x1f8   :  { %v979_v43 = vld [vmem:[%s3206_s3 + $0x98] sm:$0xff] }
 0x1f9   :  { %v650_v44 = vmax.f32 %v607_v42, 0.0  ;;  %v978_v42 = vld [vmem:[%s3206_s3 + $0x90] sm:$0xff]  ;;  %2066 = vmatpush3.bf16.msra.mxu0 %v2065_v40 }
 0x1fa   :  { %v611_v45 = vpop.f32.mrb[20].mxu1 }
 0x1fb   :  { %v1864_v46 = vpop.f32.mrb[21].mxu1  ;;  %v668_v48 = vrot.slane %v650_v44, %v2791_v41  ;;  %660 = vst.msk [vmem:[#allocation2] sm:$0x3] %vm659_vm1, %v650_v44  ;;  %v675_v49 = vcombine.high %v650_v44, %v650_v44  ;;  %v612_v53 = vadd.f32 %v611_v45, %v2788_v39  ;;  %v962_v44 = vld [vmem:[%s3206_s3 + $0x10] sm:$0xff]  ;;  %v963_v45 = vld [vmem:[%s3206_s3 + $0x18] sm:$0xff] }
 0x1fc   :  { %v1008_v46 = vld [vmem:[%s3206_s3 + $0x180] sm:$0xff] }
 0x1fd   :  { %v669_v50 = vcombine.high %v668_v48, %v668_v48  ;;  %v682_v56 = vrot.slane %v675_v49, %v2791_v41  ;;  %v651_v60 = vmax.f32 %v612_v53, 0.0  ;;  %v993_v53 = vld [vmem:[%s3206_s3 + $0x108] sm:$0xff] }
 0x1fe   :  { %v616_v51 = vpop.f32.mrb[22].mxu1 }
 0x1ff   :  { %v617_v35 = vadd.f32 %v616_v51, %v2788_v39  ;;  %670 = vrot.lane.b32.xlu0 %v669_v50, %s2190_s2  ;;  %v1867_v52 = vpop.f32.mrb[23].mxu1  ;;  %v688_v62 = vcombine.high %v682_v56, %v682_v56  ;;  %v701_v3 = vrot.slane %v651_v60, %v2791_v41  ;;  %v713_v9 = vcombine.high %v651_v60, %v651_v60  ;;  %v981_v60 = vld [vmem:[%s3206_s3 + $0xa8] sm:$0xff] }
 0x200   :  { %v2067_v50 = vpack.c.bf16 %v979_v43, %v978_v42  ;;  %v2069_v51 = vpack.c.bf16 %v963_v45, %v962_v44  ;;  %v992_v52 = vld [vmem:[%s3206_s3 + $0x100] sm:$0xff]  ;;  %v969_v43 = vld [vmem:[%s3206_s3 + $0x48] sm:$0xff] }
 0x201   :  { %v652_v54 = vmax.f32 %v617_v35, 0.0  ;;  %v707_v11 = vcombine.high %v701_v3, %v701_v3  ;;  %v720_v17 = vrot.slane %v713_v9, %v2791_v41  ;;  %v1009_v35 = vld [vmem:[%s3206_s3 + $0x188] sm:$0xff]  ;;  %v968_v42 = vld [vmem:[%s3206_s3 + $0x40] sm:$0xff] }
 0x202   :  { %v621_v57 = vpop.f32.mrb[24].mxu1  ;;  %2068 = vmatprep.subr.bf16.mxu0 %v2067_v50  ;;  %v2081_v45 = vpack.c.bf16 %v969_v43, %v968_v42 }
 0x203   :  { %683 = vrot.lane.b32.xlu0 %v682_v56, %s2191_s30  ;;  %v1870_v58 = vpop.f32.mrb[25].mxu1  ;;  %v746_v59 = vcombine.high %v652_v54, %v652_v54  ;;  %732 = vst.msk [vmem:[#allocation2 + $0x2] sm:$0x3] %vm659_vm1, %v652_v54  ;;  %v622_v61 = vadd.f32 %v621_v57, %v2788_v39  ;;  %v740_v20 = vrot.slane %v652_v54, %v2791_v41 }
 0x204   :  { %v726_v21 = vcombine.high %v720_v17, %v720_v17  ;;  %v2095_v57 = vpack.c.bf16 %v1009_v35, %v1008_v46  ;;  %v2097_v58 = vpack.c.bf16 %v993_v53, %v992_v52  ;;  %2070 = vmatpush3.bf16.msra.mxu0 %v2069_v51  ;;  %v1016_v46 = vld [vmem:[%s3206_s3 + $0x1c0] sm:$0xff]  ;;  %v986_v35 = vld [vmem:[%s3206_s3 + $0xd0] sm:$0xff]  ;;  %v987_v52 = vld [vmem:[%s3206_s3 + $0xd8] sm:$0xff] }
 0x205   :  { %v753_v0 = vrot.slane %v746_v59, %v2791_v41  ;;  %v653_v47 = vmax.f32 %v622_v61, 0.0  ;;  %v741_v28 = vcombine.high %v740_v20, %v740_v20  ;;  %v980_v59 = vld [vmem:[%s3206_s3 + $0xa0] sm:$0xff] }
 0x206   :  { %v626_v1 = vpop.f32.mrb[26].mxu1  ;;  %v964_v61 = vld [vmem:[%s3206_s3 + $0x20] sm:$0xff]  ;;  %2096 = vmatprep.subr.bf16.mxu1 %v2095_v57  ;;  %v970_v57 = vld [vmem:[%s3206_s3 + $0x50] sm:$0xff] }
 0x207   :  { %v627_v37 = vadd.f32 %v626_v1, %v2788_v39  ;;  %689 = vrot.lane.b32.xlu0 %v688_v62, %s2192_s8  ;;  %754 = vrot.lane.b32.xlu1 %v753_v0, %s2191_s30  ;;  %v1873_v2 = vpop.f32.mrb[27].mxu1  ;;  %v758_v5 = vcombine.high %v753_v0, %v753_v0  ;;  %v770_v10 = vrot.slane %v653_v47, %v2791_v41  ;;  %v965_v0 = vld [vmem:[%s3206_s3 + $0x28] sm:$0xff]  ;;  %v1010_v1 = vld [vmem:[%s3206_s3 + $0x190] sm:$0xff] }
 0x208   :  { %v780_v14 = vcombine.high %v653_v47, %v653_v47  ;;  %v2071_v62 = vpack.c.bf16 %v981_v60, %v980_v59  ;;  %v1011_v47 = vld [vmem:[%s3206_s3 + $0x198] sm:$0xff]  ;;  %2098 = vmatpush3.bf16.msra.mxu1 %v2097_v58  ;;  %v1000_v53 = vld [vmem:[%s3206_s3 + $0x140] sm:$0xff] }
 0x209   :  { %v654_v4 = vmax.f32 %v627_v37, 0.0  ;;  %v775_v7 = vcombine.high %v770_v10, %v770_v10  ;;  %v2099_v9 = vpack.c.bf16 %v1011_v47, %v1010_v1  ;;  %v971_v58 = vld [vmem:[%s3206_s3 + $0x58] sm:$0xff]  ;;  %v989_v47 = vld [vmem:[%s3206_s3 + $0xe8] sm:$0xff] }
 0x20a   :  { %v631_v6 = vpop.f32.mrb[28].mxu1  ;;  %v787_v16 = vrot.slane %v780_v14, %v2791_v41  ;;  %2072 = vmatprep.subr.bf16.mxu0 %v2071_v62  ;;  %v1013_v14 = vld [vmem:[%s3206_s3 + $0x1a8] sm:$0xff]  ;;  %v2085_v60 = vpack.c.bf16 %v971_v58, %v970_v57  ;;  %v1019_v62 = vld [vmem:[%s3206_s3 + $0x1d8] sm:$0xff] }
 0x20b   :  { %702 = vrot.lane.b32.xlu0 %v701_v3, %s2193_s9  ;;  %759 = vrot.lane.b32.xlu1 %v758_v5, %s2192_s8  ;;  %v1876_v55 = vpop.f32.mrb[29].mxu1  ;;  %797 = vst.msk [vmem:[#allocation2 + $0x4] sm:$0x3] %vm659_vm1, %v654_v4  ;;  %v811_v27 = vcombine.high %v654_v4, %v654_v4  ;;  %v805_v38 = vrot.slane %v654_v4, %v2791_v41  ;;  %v994_v4 = vld [vmem:[%s3206_s3 + $0x110] sm:$0xff]  ;;  %v995_v5 = vld [vmem:[%s3206_s3 + $0x118] sm:$0xff] }
 0x20c   :  { %v792_v36 = vcombine.high %v787_v16, %v787_v16  ;;  %v632_v48 = vadd.f32 %v631_v6, %v2788_v39  ;;  %v2073_v3 = vpack.c.bf16 %v965_v0, %v964_v61  ;;  %2100 = vmatprep.subr.bf16.mxu1 %v2099_v9  ;;  %v1018_v61 = vld [vmem:[%s3206_s3 + $0x1d0] sm:$0xff]  ;;  %v1003_v9 = vld [vmem:[%s3206_s3 + $0x158] sm:$0xff] }
 0x20d   :  { %v818_v49 = vrot.slane %v811_v27, %v2791_v41  ;;  %v806_v54 = vcombine.high %v805_v38, %v805_v38  ;;  %v1015_v27 = vld [vmem:[%s3206_s3 + $0x1b8] sm:$0xff]  ;;  %v2115_v0 = vpack.c.bf16 %v1019_v62, %v1018_v61 }
 0x20e   :  { %v636_v12 = vpop.f32.mrb[30].mxu1  ;;  %v655_v6 = vmax.f32 %v632_v48, 0.0  ;;  %2074 = vmatpush3.bf16.msra.mxu0 %v2073_v3  ;;  %v2107_v30 = vpack.c.bf16 %v1015_v27, %v1014_v26  ;;  %v1017_v48 = vld [vmem:[%s3206_s3 + $0x1c8] sm:$0xff]  ;;  %v988_v3 = vld [vmem:[%s3206_s3 + $0xe0] sm:$0xff]  ;;  %v1022_v26 = vld [vmem:[%s3206_s3 + $0x1f0] sm:$0xff] }
 0x20f   :  { %v637_v63 = vadd.f32 %v636_v12, %v2788_v39  ;;  %708 = vrot.lane.b32.xlu0 %v707_v11, %s2194_s10  ;;  %771 = vrot.lane.b32.xlu1 %v770_v10, %s2193_s9  ;;  %v1879_v13 = vpop.f32.mrb[31].mxu1  ;;  %v823_v2 = vcombine.high %v818_v49, %v818_v49  ;;  %v2101_v10 = vpack.c.bf16 %v995_v5, %v994_v4  ;;  %v982_v11 = vld [vmem:[%s3206_s3 + $0xb0] sm:$0xff]  ;;  %v983_v12 = vld [vmem:[%s3206_s3 + $0xb8] sm:$0xff] }
 0x210   :  { %v2075_v13 = vpack.c.bf16 %v983_v12, %v982_v11  ;;  %v835_v20 = vrot.slane %v655_v6, %v2791_v41  ;;  %v1002_v4 = vld [vmem:[%s3206_s3 + $0x150] sm:$0xff]  ;;  %v973_v11 = vld [vmem:[%s3206_s3 + $0x68] sm:$0xff] }
 0x211   :  { %v2815_v15 = vmax.f32 %v637_v63, 0.0  ;;  %v1012_v63 = vld [vmem:[%s3206_s3 + $0x1a0] sm:$0xff]  ;;  %2102 = vmatpush3.bf16.msra.mxu1 %v2101_v10  ;;  %v2117_v12 = vpack.c.bf16 %v1003_v9, %v1002_v4 }
 0x212   :  { %v2818_v18 = vpop.f32.mrb[32].mxu1  ;;  %2076 = vmatprep.subr.bf16.mxu0 %v2075_v13  ;;  %v840_v38 = vcombine.high %v835_v20, %v835_v20  ;;  %v972_v10 = vld [vmem:[%s3206_s3 + $0x60] sm:$0xff]  ;;  %v1021_v13 = vld [vmem:[%s3206_s3 + $0x1e8] sm:$0xff] }
 0x213   :  { %721 = vrot.lane.b32.xlu0 %v720_v17, %s2195_s11  ;;  %776 = vrot.lane.b32.xlu1 %v775_v7, %s2194_s10  ;;  %v1882_v19 = vpop.f32.mrb[33].mxu1  ;;  %862 = vst.msk [vmem:[#allocation2 + $0x6] sm:$0x3] %vm659_vm1, %v2815_v15  ;;  %v870_v56 = vrot.slane %v2815_v15, %v2791_v41  ;;  %v876_v37 = vcombine.high %v2815_v15, %v2815_v15  ;;  %v996_v7 = vld [vmem:[%s3206_s3 + $0x120] sm:$0xff] }
 0x214   :  { %v642_v15 = vadd.f32 %v2818_v18, %v2788_v39  ;;  %v2103_v17 = vpack.c.bf16 %v1013_v14, %v1012_v63  ;;  %v997_v19 = vld [vmem:[%s3206_s3 + $0x128] sm:$0xff]  ;;  %v967_v18 = vld [vmem:[%s3206_s3 + $0x38] sm:$0xff]  ;;  %v2089_v63 = vpack.c.bf16 %v973_v11, %v972_v10  ;;  %v1024_v9 = vld [vmem:[%s3206_s3 + $0x200] sm:$0xff] }
 0x215   :  { %v871_v55 = vcombine.high %v870_v56, %v870_v56  ;;  %v1001_v56 = vld [vmem:[%s3206_s3 + $0x148] sm:$0xff] }
 0x216   :  { %v646_v22 = vpop.f32.mrb[34].mxu1  ;;  %2104 = vmatprep.subr.bf16.mxu1 %v2103_v17  ;;  %v657_v29 = vmax.f32 %v642_v15, 0.0  ;;  %v2113_v59 = vpack.c.bf16 %v1001_v56, %v1000_v53  ;;  %v990_v17 = vld [vmem:[%s3206_s3 + $0xf0] sm:$0xff]  ;;  %v1025_v10 = vld [vmem:[%s3206_s3 + $0x208] sm:$0xff] }
 0x217   :  { %v647_v23 = vadd.f32 %v646_v22, %v2788_v39  ;;  %727 = vrot.lane.b32.xlu0 %v726_v21, %s2196_s12  ;;  %788 = vrot.lane.b32.xlu1 %v787_v16, %s2195_s11  ;;  %v1885_v25 = vpop.f32.mrb[35].mxu1  ;;  %v883_v21 = vrot.slane %v876_v37, %v2791_v41  ;;  %v966_v39 = vld [vmem:[%s3206_s3 + $0x30] sm:$0xff]  ;;  %v2105_v16 = vpack.c.bf16 %v997_v19, %v996_v7  ;;  %v991_v7 = vld [vmem:[%s3206_s3 + $0xf8] sm:$0xff] }
 0x218   :  { %v2077_v22 = vpack.c.bf16 %v967_v18, %v966_v39  ;;  %v985_v25 = vld [vmem:[%s3206_s3 + $0xc8] sm:$0xff]  ;;  %v900_v50 = vrot.slane %v657_v29, %v2791_v41  ;;  %v910_v1 = vcombine.high %v657_v29, %v657_v29  ;;  %v1004_v19 = vld [vmem:[%s3206_s3 + $0x160] sm:$0xff]  ;;  %v2091_v39 = vpack.c.bf16 %v991_v7, %v990_v17  ;;  %v1007_v29 = vld [vmem:[%s3206_s3 + $0x178] sm:$0xff] }
 0x219   :  { %v2841_v34 = vmax.f32 %v647_v23, 0.0  ;;  %v984_v23 = vld [vmem:[%s3206_s3 + $0xc0] sm:$0xff]  ;;  %v888_v40 = vcombine.high %v883_v21, %v883_v21  ;;  %2106 = vmatpush3.bf16.msra.mxu1 %v2105_v16  ;;  %v1005_v18 = vld [vmem:[%s3206_s3 + $0x168] sm:$0xff]  ;;  %v974_v16 = vld [vmem:[%s3206_s3 + $0x70] sm:$0xff] }
 0x21a   :  { %v2079_v24 = vpack.c.bf16 %v985_v25, %v984_v23  ;;  %2078 = vmatpush3.bf16.msra.mxu0 %v2077_v22  ;;  %2108 = vmatprep.subr.bf16.mxu1 %v2107_v30  ;;  %v917_v14 = vrot.slane %v910_v1, %v2791_v41  ;;  %v975_v22 = vld [vmem:[%s3206_s3 + $0x78] sm:$0xff]  ;;  %v2121_v23 = vpack.c.bf16 %v1005_v18, %v1004_v19  ;;  %v1029_v19 = vld [vmem:[%s3206_s3 + $0x228] sm:$0xff] }
 0x21b   :  { %742 = vrot.lane.b32.xlu0 %v741_v28, %s2190_s2  ;;  %793 = vrot.lane.b32.xlu1 %v792_v36, %s2196_s12  ;;  %927 = vst.msk [vmem:[#allocation2 + $0x8] sm:$0x3] %vm659_vm1, %v2841_v34  ;;  %v845_v28 = vcombine.high %v655_v6, %v655_v6  ;;  %v999_v36 = vld [vmem:[%s3206_s3 + $0x138] sm:$0xff]  ;;  %v941_v5 = vcombine.high %v2841_v34, %v2841_v34 }
 0x21c   :  { %2080 = vmatprep.subr.bf16.mxu0 %v2079_v24  ;;  %v2109_v44 = vpack.c.bf16 %v999_v36, %v998_v32  ;;  %v935_v6 = vrot.slane %v2841_v34, %v2791_v41  ;;  %v1020_v34 = vld [vmem:[%s3206_s3 + $0x1e0] sm:$0xff]  ;;  %v2093_v25 = vpack.c.bf16 %v975_v22, %v974_v16  ;;  %v1023_v24 = vld [vmem:[%s3206_s3 + $0x1f8] sm:$0xff]  ;;  %v922_v30 = vcombine.high %v917_v14, %v917_v14 }
 0x21d   :  { %v852_v51 = vrot.slane %v845_v28, %v2791_v41  ;;  %v2119_v15 = vpack.c.bf16 %v1021_v13, %v1020_v34  ;;  %v2123_v27 = vpack.c.bf16 %v1023_v24, %v1022_v26  ;;  %v1006_v28 = vld [vmem:[%s3206_s3 + $0x170] sm:$0xff]  ;;  %v2128_v34 = vpack.c.bf16 %v1025_v10, %v1024_v9  ;;  %v1280_v22 = vld [vmem:[%s3207_s4] sm:$0xff]  ;;  %v1283_v24 = vld [vmem:[%s3207_s4 + $0x18] sm:$0xff] }
 0x21e   :  { %2082 = vmatpush3.bf16.msra.mxu0 %v2081_v45  ;;  %2110 = vmatpush3.bf16.msra.mxu1 %v2109_v44  ;;  %v2125_v36 = vpack.c.bf16 %v1007_v29, %v1006_v28  ;;  %v1282_v26 = vld [vmem:[%s3207_s4 + $0x10] sm:$0xff]  ;;  %v1285_v28 = vld [vmem:[%s3207_s4 + $0x28] sm:$0xff]  ;;  %v1376_v10 = vsub.s32 4, %v2747_v33 }
 0x21f   :  { %819 = vrot.lane.b32.xlu0 %v818_v49, %s2191_s30  ;;  %807 = vrot.lane.b32.xlu1 %v806_v54, %s2190_s2  ;;  %v2111_v49 = vpack.c.bf16 %v1017_v48, %v1016_v46  ;;  %v2083_v54 = vpack.c.bf16 %v987_v52, %v986_v35  ;;  %v857_v37 = vcombine.high %v852_v51, %v852_v51 }
 0x221   :  { %2112 = vmatprep.subr.bf16.mxu1 %v2111_v49  ;;  %2084 = vmatprep.subr.bf16.mxu0 %v2083_v54 }
 0x222   :  { %2114 = vmatpush3.bf16.msra.mxu1 %v2113_v59  ;;  %2086 = vmatpush3.bf16.msra.mxu0 %v2085_v60 }
 0x223   :  { %824 = vrot.lane.b32.xlu0 %v823_v2, %s2192_s8  ;;  %872 = vrot.lane.b32.xlu1 %v871_v55, %s2190_s2  ;;  %v905_v2 = vcombine.high %v900_v50, %v900_v50  ;;  %v2087_v55 = vpack.c.bf16 %v989_v47, %v988_v3 }
 0x224   :  { %2116 = vmatprep.subr.bf16.mxu1 %v2115_v0 }
 0x225   :  { %2088 = vmatprep.subr.bf16.mxu0 %v2087_v55 }
 0x226   :  { %2118 = vmatpush3.bf16.msra.mxu1 %v2117_v12  ;;  %2090 = vmatpush3.bf16.msra.mxu0 %v2089_v63 }
 0x227   :  { %836 = vrot.lane.b32.xlu0 %v835_v20, %s2193_s9  ;;  %884 = vrot.lane.b32.xlu1 %v883_v21, %s2191_s30  ;;  %v936_v20 = vcombine.high %v935_v6, %v935_v6  ;;  %v948_v21 = vrot.slane %v941_v5, %v2791_v41 }
 0x228   :  { %2120 = vmatprep.subr.bf16.mxu1 %v2119_v15  ;;  %2092 = vmatprep.subr.bf16.mxu0 %v2091_v39  ;;  %v1027_v15 = vld [vmem:[%s3206_s3 + $0x218] sm:$0xff] }
 0x229   :  { %v953_v32 = vcombine.high %v948_v21, %v948_v21  ;;  %v1031_v39 = vld [vmem:[%s3206_s3 + $0x238] sm:$0xff] }
 0x22a   :  { %2122 = vmatpush3.bf16.msra.mxu1 %v2121_v23  ;;  %2094 = vmatpush3.bf16.msra.mxu0 %v2093_v25  ;;  %v1281_v23 = vld [vmem:[%s3207_s4 + $0x8] sm:$0xff] }
 0x22b   :  { %841 = vrot.lane.b32.xlu0 %v840_v38, %s2194_s10  ;;  %889 = vrot.lane.b32.xlu1 %v888_v40, %s2192_s8  ;;  %v2140_v25 = vpack.c.bf16 %v1281_v23, %v1280_v22 }
 0x22c   :  { %2124 = vmatprep.subr.bf16.mxu1 %v2123_v27  ;;  %2127 = vmatprep.subr.bf16.mxu0 %v2186_v8  ;;  %v2143_v27 = vpack.c.bf16 %v1283_v24, %v1282_v26 }
 0x22e   :  { %2126 = vmatpush3.bf16.msra.mxu1 %v2125_v36 }
 0x22f   :  { %853 = vrot.lane.b32.xlu0 %v852_v51, %s2195_s11  ;;  %901 = vrot.lane.b32.xlu1 %v900_v50, %s2193_s9 }
 0x230   :  { %2139 = vmatprep.subr.bf16.mxu1 %v2186_v8 }
 0x233   :  { %858 = vrot.lane.b32.xlu0 %v857_v37, %s2196_s12  ;;  %906 = vrot.lane.b32.xlu1 %v905_v2, %s2194_s10 }
 0x237   :  { %918 = vrot.lane.b32.xlu1 %v917_v14, %s2195_s11  ;;  %937 = vrot.lane.b32.xlu0 %v936_v20, %s2190_s2  ;;  %v1026_v14 = vld [vmem:[%s3206_s3 + $0x210] sm:$0xff] }
 0x238   :  { %v2131_v7 = vpack.c.bf16 %v1027_v15, %v1026_v14 }
 0x23b   :  { %923 = vrot.lane.b32.xlu1 %v922_v30, %s2196_s12  ;;  %954 = vrot.lane.b32.xlu0 %v953_v32, %s2192_s8  ;;  %v1286_v30 = vld [vmem:[%s3207_s4 + $0x30] sm:$0xff]  ;;  %v1287_v32 = vld [vmem:[%s3207_s4 + $0x38] sm:$0xff] }
 0x23c   :  { %v2149_v36 = vpack.c.bf16 %v1287_v32, %v1286_v30 }
 0x23f   :  { %949 = vrot.lane.b32.xlu1 %v948_v21, %s2191_s30  ;;  %v1030_v21 = vld [vmem:[%s3206_s3 + $0x230] sm:$0xff] }
 0x240   :  { %v2137_v18 = vpack.c.bf16 %v1031_v39, %v1030_v21 }
 0x271   :  { %v671_v38 = vpop.permute.xlu0 %670 }
 0x272   :  { %674 = vst.msk [vmem:[#allocation2] sm:$0x3] %vm673_vm2, %v671_v38  ;;  %v1366_v38 = vld [vmem:[%s3208_s5] sm:$0xff] }
 0x275   :  { %v684_v40 = vpop.permute.xlu0 %683 }
 0x276   :  { %687 = vst.msk [vmem:[#allocation2] sm:$0x3] %vm686_vm3, %v684_v40  ;;  %v1367_v40 = vld [vmem:[%s3208_s5 + $0x8] sm:$0xff] }
 0x279   :  { %v690_v42 = vpop.permute.xlu0 %689  ;;  %v755_v43 = vpop.permute.xlu1 %754 }
 0x27a   :  { %693 = vst.msk [vmem:[#allocation2] sm:$0x3] %vm692_vm4, %v690_v42  ;;  %v1368_v42 = vld [vmem:[%s3208_s5 + $0x10] sm:$0xff] }
 0x27d   :  { %v703_v44 = vpop.permute.xlu0 %702  ;;  %v760_v45 = vpop.permute.xlu1 %759 }
 0x27e   :  { %706 = vst.msk [vmem:[#allocation2] sm:$0x3] %vm705_vm5, %v703_v44  ;;  %v1369_v44 = vld [vmem:[%s3208_s5 + $0x18] sm:$0xff] }
 0x281   :  { %v709_v46 = vpop.permute.xlu0 %708  ;;  %v772_v48 = vpop.permute.xlu1 %771 }
 0x282   :  { %712 = vst.msk [vmem:[#allocation2] sm:$0x3] %vm711_vm6, %v709_v46  ;;  %v1370_v46 = vld [vmem:[%s3208_s5 + $0x20] sm:$0xff] }
 0x285   :  { %v722_v49 = vpop.permute.xlu0 %721  ;;  %v777_v50 = vpop.permute.xlu1 %776 }
 0x286   :  { %725 = vst.msk [vmem:[#allocation2] sm:$0x3] %vm724_vm7, %v722_v49 }
 0x289   :  { %v728_v51 = vpop.permute.xlu0 %727  ;;  %v789_v35 = vpop.permute.xlu1 %788 }
 0x28a   :  { %731 = vst.msk [vmem:[#allocation2] sm:$0x3] %vm730_vm8, %v728_v51 }
 0x28d   :  { %v743_v52 = vpop.permute.xlu0 %742  ;;  %v794_v53 = vpop.permute.xlu1 %793 }
 0x28e   :  { %745 = vst.msk [vmem:[#allocation2 + $0x2] sm:$0x3] %vm673_vm2, %v743_v52 }
 0x28f   :  { %757 = vst.msk [vmem:[#allocation2 + $0x2] sm:$0x3] %vm686_vm3, %v755_v43  ;;  %v2152_v43 = vpack.c.bf16 %v1367_v40, %v1366_v38 }
 0x290   :  { %762 = vst.msk [vmem:[#allocation2 + $0x2] sm:$0x3] %vm692_vm4, %v760_v45  ;;  %v2155_v45 = vpack.c.bf16 %v1369_v44, %v1368_v42 }
 0x291   :  { %774 = vst.msk [vmem:[#allocation2 + $0x2] sm:$0x3] %vm705_vm5, %v772_v48  ;;  %v820_v54 = vpop.permute.xlu0 %819  ;;  %v808_v56 = vpop.permute.xlu1 %807  ;;  %v1371_v48 = vld [vmem:[%s3208_s5 + $0x28] sm:$0xff] }
 0x292   :  { %779 = vst.msk [vmem:[#allocation2 + $0x2] sm:$0x3] %vm711_vm6, %v777_v50  ;;  %v2158_v49 = vpack.c.bf16 %v1371_v48, %v1370_v46  ;;  %v1034_v50 = vsub.s32 2, %v2747_v33 }
 0x293   :  { %810 = vst.msk [vmem:[#allocation2 + $0x4] sm:$0x3] %vm673_vm2, %v808_v56 }
 0x294   :  { %791 = vst.msk [vmem:[#allocation2 + $0x2] sm:$0x3] %vm724_vm7, %v789_v35  ;;  %v2185_v35 = vld [vmem:[%s3205_s6] sm:$0x7f] }
 0x295   :  { %822 = vst.msk [vmem:[#allocation2 + $0x4] sm:$0x3] %vm686_vm3, %v820_v54  ;;  %v825_v57 = vpop.permute.xlu0 %824  ;;  %v873_v58 = vpop.permute.xlu1 %872  ;;  %v1035_v52 = vrot.slane %v2185_v35, %v1034_v50 }
 0x296   :  { %796 = vst.msk [vmem:[#allocation2 + $0x2] sm:$0x3] %vm730_vm8, %v794_v53 }
 0x297   :  { %827 = vst.msk [vmem:[#allocation2 + $0x4] sm:$0x3] %vm692_vm4, %v825_v57 }
 0x298   :  { %875 = vst.msk [vmem:[#allocation2 + $0x6] sm:$0x3] %vm673_vm2, %v873_v58 }
 0x299   :  { %v837_v59 = vpop.permute.xlu0 %836  ;;  %v885_v60 = vpop.permute.xlu1 %884 }
 0x29a   :  { %839 = vst.msk [vmem:[#allocation2 + $0x4] sm:$0x3] %vm705_vm5, %v837_v59 }
 0x29b   :  { %887 = vst.msk [vmem:[#allocation2 + $0x6] sm:$0x3] %vm686_vm3, %v885_v60 }
 0x29d   :  { %v842_v61 = vpop.permute.xlu0 %841  ;;  %v890_v62 = vpop.permute.xlu1 %889 }
 0x29e   :  { %844 = vst.msk [vmem:[#allocation2 + $0x4] sm:$0x3] %vm711_vm6, %v842_v61 }
 0x29f   :  { %892 = vst.msk [vmem:[#allocation2 + $0x6] sm:$0x3] %vm692_vm4, %v890_v62 }
 0x2a1   :  { %v854_v0 = vpop.permute.xlu0 %853  ;;  %v902_v1 = vpop.permute.xlu1 %901 }
 0x2a2   :  { %856 = vst.msk [vmem:[#allocation2 + $0x4] sm:$0x3] %vm724_vm7, %v854_v0 }
 0x2a3   :  { %904 = vst.msk [vmem:[#allocation2 + $0x6] sm:$0x3] %vm705_vm5, %v902_v1 }
 0x2a5   :  { %v859_v37 = vpop.permute.xlu0 %858  ;;  %v907_v2 = vpop.permute.xlu1 %906 }
 0x2a6   :  { %861 = vst.msk [vmem:[#allocation2 + $0x4] sm:$0x3] %vm730_vm8, %v859_v37  ;;  %v1373_v37 = vld [vmem:[%s3208_s5 + $0x38] sm:$0xff] }
 0x2a7   :  { %909 = vst.msk [vmem:[#allocation2 + $0x6] sm:$0x3] %vm711_vm6, %v907_v2 }
 0x2a9   :  { %v919_v3 = vpop.permute.xlu1 %918  ;;  %v938_v47 = vpop.permute.xlu0 %937 }
 0x2aa   :  { %921 = vst.msk [vmem:[#allocation2 + $0x6] sm:$0x3] %vm724_vm7, %v919_v3  ;;  %v1455_v3 = vrot.slane %v2185_v35, 5 }
 0x2ab   :  { %940 = vst.msk [vmem:[#allocation2 + $0x8] sm:$0x3] %vm673_vm2, %v938_v47  ;;  %v1290_v47 = vsub.s32 3, %v2747_v33 }
 0x2ac   :  { %1456 = vrot.lane.b32.xlu1 %v1455_v3, %s2197_s18 }
 0x2ad   :  { %v924_v4 = vpop.permute.xlu1 %923  ;;  %v955_v6 = vpop.permute.xlu0 %954 }
 0x2ae   :  { %926 = vst.msk [vmem:[#allocation2 + $0x6] sm:$0x3] %vm730_vm8, %v924_v4  ;;  %v1291_v4 = vrot.slane %v2185_v35, %v1290_v47 }
 0x2b1   :  { %v950_v5 = vpop.permute.xlu1 %949 }
 0x2b2   :  { %952 = vst.msk [vmem:[#allocation2 + $0x8] sm:$0x3] %vm686_vm3, %v950_v5 }
 0x2b3   :  { %957 = vst.msk [vmem:[#allocation2 + $0x8] sm:$0x3] %vm692_vm4, %v955_v6 }
 0x2b5   :  { %v958_v55 = vld [vmem:[#allocation2] sm:$0xff] }
 0x2b6   :  { %v1045_v11 = vrot.slane %v958_v55, %v2791_v41  ;;  %v1038_v12 = vcombine.high %v958_v55, %v958_v55 }
 0x2b8   :  { %v1053_v63 = vcombine.high %v1045_v11, %v1045_v11  ;;  %v1052_v13 = vrot.slane %v1038_v12, %v2791_v41  ;;  %v1028_v41 = vld [vmem:[%s3206_s3 + $0x220] sm:$0xff] }
 0x2b9   :  { %v2134_v20 = vpack.c.bf16 %v1029_v19, %v1028_v41  ;;  %v1465_v41 = vmul.f32 %v2185_v35, %v2185_v35 }
 0x2ba   :  { %1133 = vmatprep.mubr.f32.mxu0 %v1053_v63  ;;  %v1054_v17 = vcombine.high %v1052_v13, %v1052_v13  ;;  %v1524_v16 = vld.sshfl [vmem:[#allocation2 + $0x8] sm:$0x3 pattern:$0x76325410] }
 0x2bb   :  { %1134 = vmatmul.mubr.f32.vlgmr.msra.gmra.mrb[36].mxu0 %v1045_v11  ;;  %v1377_v11 = vrot.slane %v2185_v35, %v1376_v10  ;;  %v1467_v19 = vsel %vm1466_vm10, %v1465_v41, 0.0 }
 0x2bc   :  { %2129 = vmatpush3.bf16.msra.mxu0 %v2128_v34  ;;  %1203 = vmatprep.mubr.f32.mxu1 %v1054_v17 }
 0x2bd   :  { %1204 = vmatmul.mubr.f32.vlgmr.msra.gmra.mrb[36].mxu1 %v1052_v13  ;;  %2130 = vmatprep.subr.bf16.mxu0 %v2186_v8 }
 0x2be   :  { %1902 = vmatprep.mubr.msk.f32.mxu0 %vm2187_vm0, %v2188_v31  ;;  %1921 = vmatprep.mubr.msk.f32.mxu1 %vm2187_vm0, %v2188_v31 }
 0x2bf   :  { %2141 = vmatpush3.bf16.msra.mxu1 %v2140_v25 }
 0x2c0   :  { %2132 = vmatpush3.bf16.msra.mxu0 %v2131_v7  ;;  %2142 = vmatprep.subr.bf16.mxu1 %v2186_v8 }
 0x2c1   :  { %2133 = vmatprep.subr.bf16.mxu0 %v2186_v8 }
 0x2c3   :  { %2144 = vmatpush3.bf16.msra.mxu1 %v2143_v27 }
 0x2c4   :  { %2135 = vmatpush3.bf16.msra.mxu0 %v2134_v20  ;;  %2145 = vmatprep.subr.bf16.mxu1 %v2186_v8 }
 0x2c5   :  { %2136 = vmatprep.subr.bf16.mxu0 %v2186_v8 }
 0x2c8   :  { %2138 = vmatpush3.bf16.msra.mxu0 %v2137_v18 }
 0x2c9   :  { %2151 = vmatprep.subr.bf16.mxu0 %v2186_v8 }
 0x2cb   :  { %1903 = vmatmul.mubr.msk.f32.vlgmr.msra.gmra.mrb[38].mxu0 %vm1066_vm9, %v1524_v16 }
 0x2cc   :  { %1940 = vmatprep.mubr.msk.f32.mxu0 %vm2187_vm0, %v2188_v31  ;;  %v1284_v31 = vld [vmem:[%s3207_s4 + $0x20] sm:$0xff]  ;;  %2153 = vmatpush3.bf16.msra.mxu0 %v2152_v43 }
 0x2cd   :  { %v2146_v29 = vpack.c.bf16 %v1285_v28, %v1284_v31  ;;  %2154 = vmatprep.subr.bf16.mxu0 %v2186_v8 }
 0x2cf   :  { %2147 = vmatpush3.bf16.msra.mxu1 %v2146_v29 }
 0x2d0   :  { %2148 = vmatprep.subr.bf16.mxu1 %v2186_v8  ;;  %2156 = vmatpush3.bf16.msra.mxu0 %v2155_v45 }
 0x2d1   :  { %2157 = vmatprep.subr.bf16.mxu0 %v2186_v8 }
 0x2d3   :  { %2150 = vmatpush3.bf16.msra.mxu1 %v2149_v36 }
 0x2d4   :  { %2159 = vmatpush3.bf16.msra.mxu0 %v2158_v49 }
 0x2d5   :  { %2160 = vmatprep.subr.bf16.mxu0 %v2186_v8  ;;  %v1372_v8 = vld [vmem:[%s3208_s5 + $0x30] sm:$0xff]  ;;  %s2198_s5 = smov 124  }
 0x2d6   :  { %v2161_v2 = vpack.c.bf16 %v1373_v37, %v1372_v8 }
 0x2d8   :  { %2162 = vmatpush3.bf16.msra.mxu0 %v2161_v2 }
 0x31e   :  { %v1457_v15 = vpop.permute.xlu1 %1456 }
 0x38e   :  { %v1762_v51 = vpop.f32.mrb[36].mxu0 }
 0x38f   :  { %v1763_v53 = vpop.f32.mrb[37].mxu0 }
 0x390   :  { %v1764_v54 = vadd.f32 %v1763_v53, %v1762_v51  ;;  %v1797_v56 = vpop.f32.mrb[36].mxu1 }
 0x391   :  { %v1798_v57 = vpop.f32.mrb[37].mxu1 }
 0x392   :  { %v1136_v58 = vadd.f32 %v1764_v54, %v1035_v52  ;;  %v1799_v59 = vadd.f32 %v1798_v57, %v1797_v56 }
 0x394   :  { %v1206_v60 = vadd.f32 %v1799_v59, %v1136_v58 }
 0x39e   :  { %v1275_v61 = vpop.f32.mrb[38].mxu0 }
 0x39f   :  { %v1276_v62 = vadd.f32 %v1275_v61, %v1206_v60  ;;  %v1904_v0 = vpop.f32.mrb[39].mxu0 }
 0x3a1   :  { %v1279_v1 = vmax.f32 %v1276_v62, 0.0 }
 0x3a3   :  { %1922 = vmatmul.mubr.msk.f32.vlgmr.msra.gmra.mrb[38].mxu1 %vm1066_vm9, %v1279_v1 }
 0x476   :  { %v1361_v5 = vpop.f32.mrb[38].mxu1 }
 0x477   :  { %v1362_v6 = vadd.f32 %v1361_v5, %v1291_v4  ;;  %v1923_v55 = vpop.f32.mrb[39].mxu1 }
 0x479   :  { %v1365_v9 = vmax.f32 %v1362_v6, 0.0 }
 0x47b   :  { %1941 = vmatmul.mubr.msk.f32.vlgmr.msra.gmra.mrb[40].mxu0 %vm1066_vm9, %v1365_v9 }
 0x54e   :  { %v1447_v12 = vpop.f32.mrb[40].mxu0 }
 0x54f   :  { %v1448_v63 = vadd.f32 %v1447_v12, %v1377_v11  ;;  %v1942_v34 = vpop.f32.mrb[41].mxu0 }
 0x551   :  { %v1451_v13 = vmul.f32 0.5, %v1448_v63  ;;  %1471 = vrot.lane.b32.xlu1 %v1448_v63, %s2198_s5 }
 0x553   :  { %v1452_v14 = vmul.f32 1.442695, %v1451_v13 }
 0x555   :  { %2177 = vpow2.f32 %v1452_v14 }
 0x55f   :  { %v2178_v17 = vpop.eup %2177 }
 0x560   :  { %v1459_v7 = vmul.f32 %v2178_v17, %v1457_v15 }
 0x562   :  { %1461 = vrot.lane.b32.xlu0 %v1459_v7, %s2198_s5 }
 0x581   :  { %1468 = vadd.xlane.f32.xlu0 %v1467_v19 }
 0x5c3   :  { %v1472_v20 = vpop.permute.xlu1 %1471 }
 0x5c4   :  { %v1475_v33 = vsel %vm1474_vm11, %v1472_v20, 0.0 }
 0x5c5   :  { %1476 = vadd.xlane.f32.xlu1 %v1475_v33 }
 0x5d4   :  { %v1462_v21 = vpop.permute.xlu0 %1461 }
 0x5d5   :  { %v1464_v39 = vadd.f32 %v1462_v21, %v1448_v63 }
 0x5d7   :  { %v1484_v18 = vmul.f32 -2.0, %v1464_v39  ;;  %v1504_v42 = vsub.f32 0.6931472, %v1464_v39 }
 0x5d9   :  { %v1486_v16 = vsub.f32 0.0, %v1484_v18  ;;  %v1485_v36 = vmax.f32 %v1484_v18, 0.0 }
 0x5db   :  { %v1489_v22 = vand.u32 2147483647, %v1486_v16  ;;  %vm1487_vm13 = vcmp.ne.f32.partialorder %v1486_v16, %v1486_v16 }
 0x5dd   :  { %v1490_v23 = vsub.f32 0.0, %v1489_v22 }
 0x5df   :  { %v1491_v25 = vmul.f32 1.442695, %v1490_v23 }
 0x5e1   :  { %2179 = vpow2.f32 %v1491_v25 }
 0x5eb   :  { %v2180_v26 = vpop.eup %2179 }
 0x5ec   :  { %v1493_v24 = vadd.f32 1.0, %v2180_v26  ;;  %v1496_v27 = vmul.f32 -0.5, %v2180_v26  ;;  %v1499_v28 = vand.u32 2147483647, %v2180_v26 }
 0x5ee   :  { %2181 = vlog2.f32 %v1493_v24  ;;  %v1497_v31 = vadd.f32 1.0, %v1496_v27  ;;  %vm1500_vm12 = vcmp.lt.f32.partialorder %v1499_v28, 0.0004427343 }
 0x5ef   :  { %2183 = vtanh.f32 %v1464_v39 }
 0x5f0   :  { %v1498_v32 = vmul.f32 %v2180_v26, %v1497_v31 }
 0x5f8   :  { %v2182_v29 = vpop.eup %2181 }
 0x5f9   :  { %v1495_v30 = vmul.f32 0.6931472, %v2182_v29  ;;  %v2184_v56 = vpop.eup %2183 }
 0x5fb   :  { %v1501_v38 = vsel %vm1500_vm12, %v1498_v32, %v1495_v30 }
 0x5fc   :  { %v1502_v40 = vadd.f32 %v1501_v38, %v1485_v36 }
 0x5fe   :  { %v1503_v43 = vsel %vm1487_vm13, %v1484_v18, %v1502_v40 }
 0x5ff   :  { %v1505_v44 = vsub.f32 %v1504_v42, %v1503_v43 }
 0x601   :  { %v1506_v45 = vmul.f32 2.0, %v1505_v44 }
 0x603   :  { %v1507_v46 = vsel %vm1474_vm11, %v1506_v45, 0.0 }
 0x604   :  { %1508 = vadd.xlane.f32.xlu0 %v1507_v46 }
 0x60e   :  { %v1469_v49 = vpop.xlane.xlu0 %1468 }
 0x60f   :  { %v1480_v51 = vrot.slane %v1469_v49, 5 }
 0x652   :  { %v1477_v48 = vpop.xlane.xlu1 %1476 }
 0x653   :  { %v1478_v50 = vadd.f32 7.351508, %v1477_v48 }
 0x655   :  { %v1482_v35 = vadd.f32 %v1480_v51, %v1478_v50 }
 0x657   :  { %v1483_v52 = vmul.f32 -0.5, %v1482_v35 }
 0x691   :  { %v1509_v53 = vpop.xlane.xlu0 %1508 }
 0x692   :  { %v1511_v54 = vsub.f32 %v1483_v52, %v1509_v53 }
 0x694   :  { %1513 = vrot.lane.b32.xlu0 %v1511_v54, %s2197_s18 }
 0x706   :  { %v1514_v57 = vpop.permute.xlu0 %1513 }
 0x707   :  { %v1517_v58 = vsel %vm1516_vm14, %v2184_v56, %v1514_v57 }
 0x708   :  { %1519 = vst.msk [vmem:[%s3209_s7] sm:$0x3] %vm1518_vm15, %v1517_v58 }

</bundles_post_ra>
